<compile_context>
chip_gen: v6e
topology: v6e:2x2x1
jax: 0.10.0
libtpu: 0.0.40
codegen_flags: <defaults>
</compile_context>

<pallas_src>
import functools
import math

import jax
import jax.numpy as jnp
import numpy as np
from jax.experimental import pallas as pl
from jax.experimental.pallas import tpu as pltpu


# ----------------------------- Pallas kernels ------------------------------

def _window_attention_kernel(x_ref, g1_ref, b1_ref, wq_ref, wk_ref, wv_ref,
                             wp_ref, bp_ref, bias_ref, o_ref, *,
                             num_heads, window_batch, scale, eps):
    """WB windows per grid step: fused LN1 + qkv + batched MHA + proj.

    x_ref    : [WB*N, C]           raw (pre-norm) tokens of WB windows
    g1_ref   : [1, C]              LayerNorm1 weight
    b1_ref   : [1, C]              LayerNorm1 bias
    wq/wk/wv : [C, C]              q/k/v weights, [in, out] layout, bf16
    wp_ref   : [heads, d, C]       proj weight, per-head [in, out] blocks, bf16
    bp_ref   : [1, C]              proj bias
    bias_ref : [heads, WBb, N, N]  rel-pos bias (+ shift mask), WBb in {1, WB}
    o_ref    : [WB*N, C]           attention-branch output (pre-residual)
    """
    H = num_heads
    WB = window_batch
    T, C = x_ref.shape
    N = T // WB
    d = C // H

    # --- LayerNorm1 (per token, f32) ---
    x = x_ref[...].astype(jnp.float32)
    mu = jnp.mean(x, axis=-1, keepdims=True)
    var = jnp.mean(jnp.square(x - mu), axis=-1, keepdims=True)
    xn = (x - mu) * jax.lax.rsqrt(var + eps)
    xn = (xn * g1_ref[...] + b1_ref[...]).astype(jnp.bfloat16)

    # --- QKV projection (bf16 MXU, f32 accumulation) ---
    q = jnp.dot(xn, wq_ref[...], preferred_element_type=jnp.float32) * scale
    k = jnp.dot(xn, wk_ref[...], preferred_element_type=jnp.float32)
    v = jnp.dot(xn, wv_ref[...], preferred_element_type=jnp.float32)

    def to_heads(t):  # [T, C] -> [H*WB, N, d]; batch index = h*WB + w
        th = jnp.stack([t[:, h * d:(h + 1) * d] for h in range(H)], axis=0)
        return th.reshape(H * WB, N, d)

    qh = to_heads(q).astype(jnp.bfloat16)
    kh = to_heads(k).astype(jnp.bfloat16)
    vh = to_heads(v).astype(jnp.bfloat16)

    # --- batched scores over (head, window); softmax in f32 ---
    s = jnp.einsum('bnd,bmd->bnm', qh, kh,
                   preferred_element_type=jnp.float32)          # [H*WB, N, N]
    bias = bias_ref[...].astype(jnp.float32)                    # [H, WBb, N, N]
    if bias.shape[1] != WB:                                     # static check
        bias = jnp.broadcast_to(bias, (H, WB, N, N))
    s = s + bias.reshape(H * WB, N, N)
    s = s - jnp.max(s, axis=-1, keepdims=True)
    e = jnp.exp(s)
    p = e * pl.reciprocal(jnp.sum(e, axis=-1, keepdims=True), approx=True)

    o = jnp.einsum('bnm,bmd->bnd', p.astype(jnp.bfloat16), vh,
                   preferred_element_type=jnp.float32)          # [H*WB, N, d]
    o = o.reshape(H, T, d).astype(jnp.bfloat16)

    # --- head merge folded into the output projection ---
    y = jnp.zeros((T, C), jnp.float32)
    for h in range(H):
        y = y + jnp.dot(o[h], wp_ref[h], preferred_element_type=jnp.float32)
    o_ref[...] = (y + bp_ref[...]).astype(o_ref.dtype)


def _mlp_block_kernel(sc_ref, ab_ref, g2_ref, b2_ref, w1_ref, bb1_ref,
                      w2_ref, bb2_ref, o_ref, *, eps):
    """Token tile per grid step: (shortcut + attn branch) + LN2 + MLP + residual."""
    x = sc_ref[...].astype(jnp.float32) + ab_ref[...].astype(jnp.float32)
    mu = jnp.mean(x, axis=-1, keepdims=True)
    var = jnp.mean(jnp.square(x - mu), axis=-1, keepdims=True)
    xn = (x - mu) * jax.lax.rsqrt(var + eps)
    xn = (xn * g2_ref[...] + b2_ref[...]).astype(jnp.bfloat16)

    h = jnp.dot(xn, w1_ref[...], preferred_element_type=jnp.float32) + bb1_ref[...]
    # TODO(synk): PyTorch nn.GELU() default is the exact erf form; tanh-GELU is
    # used here to guarantee Mosaic lowering (difference ~1e-3).
    h = jax.nn.gelu(h, approximate=True)
    y = jnp.dot(h.astype(jnp.bfloat16), w2_ref[...],
                preferred_element_type=jnp.float32) + bb2_ref[...]
    o_ref[...] = (x + y).astype(o_ref.dtype)


# --------------------- host-side constant precomputation --------------------

def _relative_position_index(ws: int) -> np.ndarray:
    coords = np.stack(np.meshgrid(np.arange(ws), np.arange(ws), indexing="ij"))
    coords_flatten = coords.reshape(2, -1)                       # [2, N]
    rel = coords_flatten[:, :, None] - coords_flatten[:, None, :]
    rel = rel.transpose(1, 2, 0).copy()                          # [N, N, 2]
    rel[:, :, 0] += ws - 1
    rel[:, :, 1] += ws - 1
    rel[:, :, 0] *= 2 * ws - 1
    return rel.sum(-1)                                           # [N, N]


def _shift_attention_mask(H, W, ws, shift) -> np.ndarray:
    img_mask = np.zeros((1, H, W, 1), dtype=np.float32)
    slices = (slice(0, -ws), slice(-ws, -shift), slice(-shift, None))
    cnt = 0
    for hs in slices:
        for wsl in slices:
            img_mask[:, hs, wsl, :] = cnt
            cnt += 1
    mw = img_mask.reshape(1, H // ws, ws, W // ws, ws, 1)
    mw = mw.transpose(0, 1, 3, 2, 4, 5).reshape(-1, ws * ws)      # [nW, N]
    am = mw[:, None, :] - mw[:, :, None]                          # [nW, N, N]
    return np.where(am != 0, -100.0, 0.0).astype(np.float32)


def _pick_window_batch(nW, num_windows, N):
    """Largest divisor of nW with WB*N <= 512 token rows, keeping grid >= 2."""
    best = 1
    for cand in range(1, nW + 1):
        if nW % cand == 0 and cand * N <= 512:
            best = cand
    while best > 1 and (num_windows // best) < 2:
        cand = best - 1
        while cand > 1 and nW % cand != 0:
            cand -= 1
        best = cand
    return best


# ------------------------------ JAX wrapper ---------------------------------

def swin_transformer_block(x, params, *, input_resolution, num_heads,
                           window_size, shift_size, mlp_ratio=4.0):
    """Forward pass equivalent to the PyTorch SwinTransformerBlock (eval mode).

    x : [B, L, C] with L == H * W.
    """
    Hres, Wres = input_resolution
    B, L, C = x.shape
    assert L == Hres * Wres, "Input feature has wrong size"
    ws = window_size
    N = ws * ws
    nW = (Hres // ws) * (Wres // ws)
    num_windows = B * nW
    d_head = C // num_heads
    scale = float(d_head) ** -0.5
    hidden = int(C * mlp_ratio)

    # ---- one-time host-side weight prep: [in, out] layout, bf16 for the MXU ----
    wq_t = params["qkv_w"][0:C].T.astype(jnp.bfloat16)               # [C, C]
    wk_t = params["qkv_w"][C:2 * C].T.astype(jnp.bfloat16)           # [C, C]
    wv_t = params["qkv_w"][2 * C:3 * C].T.astype(jnp.bfloat16)       # [C, C]
    wp3 = params["proj_w"].T.reshape(num_heads, d_head, C).astype(jnp.bfloat16)
    fc1_t = params["fc1_w"].T.astype(jnp.bfloat16)                   # [C, hidden]
    fc2_t = params["fc2_w"].T.astype(jnp.bfloat16)                   # [hidden, C]

    # relative-position bias (+ shift mask), head-major, bf16: [heads, nWb, N, N]
    rel_idx = _relative_position_index(ws).reshape(-1)
    rel_bias = params["rpb_table"][rel_idx].reshape(N, N, num_heads)
    rel_bias = rel_bias.transpose(2, 0, 1)                           # [h, N, N]
    if shift_size > 0:
        mask = jnp.asarray(_shift_attention_mask(Hres, Wres, ws, shift_size))
        attn_bias = rel_bias[:, None, :, :] + mask[None, :, :, :]    # [h,nW,N,N]
    else:
        attn_bias = rel_bias[:, None, :, :]                          # [h,1,N,N]
    attn_bias = attn_bias.astype(jnp.bfloat16)
    nW_mask = attn_bias.shape[1]

    # spatial layout + cyclic shift + window partition (XLA data movement)
    xs = x.reshape(B, Hres, Wres, C)
    if shift_size > 0:
        xs = jnp.roll(xs, shift=(-shift_size, -shift_size), axis=(1, 2))
    xw = xs.reshape(B, Hres // ws, ws, Wres // ws, ws, C)
    xw = xw.transpose(0, 1, 3, 2, 4, 5).reshape(num_windows * N, C)

    # ---- fused LN1 + window attention + proj, WB windows per grid step ----
    WB = _pick_window_batch(nW, num_windows, N)
    if nW_mask > 1:
        n_bias_blocks = nW // WB
        bias_spec = pl.BlockSpec((num_heads, WB, N, N),
                                 lambda g: (0, g % n_bias_blocks, 0, 0))
    else:
        bias_spec = pl.BlockSpec((num_heads, 1, N, N),
                                 lambda g: (0, 0, 0, 0))

    tok_spec = pl.BlockSpec((WB * N, C), lambda g: (g, 0))
    vec_c = pl.BlockSpec((1, C), lambda g: (0, 0))
    mat_cc = pl.BlockSpec((C, C), lambda g: (0, 0))

    attn_flat = pl.pallas_call(
        functools.partial(_window_attention_kernel, num_heads=num_heads,
                          window_batch=WB, scale=scale, eps=1e-5),
        grid=(num_windows // WB,),
        in_specs=[
            tok_spec,
            vec_c, vec_c,                                    # LN1 weight / bias
            mat_cc, mat_cc, mat_cc,                          # wq / wk / wv
            pl.BlockSpec((num_heads, d_head, C), lambda g: (0, 0, 0)),  # proj w
            vec_c,                                           # proj bias
            bias_spec,
        ],
        out_specs=tok_spec,
        out_shape=jax.ShapeDtypeStruct((num_windows * N, C), x.dtype),
        compiler_params=pltpu.CompilerParams(
            dimension_semantics=("parallel",),
            vmem_limit_bytes=32 * 1024 * 1024),
    )(xw,
      params["norm1_w"].reshape(1, C), params["norm1_b"].reshape(1, C),
      wq_t, wk_t, wv_t, wp3, params["proj_b"].reshape(1, C),
      attn_bias)

    # window reverse + reverse cyclic shift (XLA data movement)
    aw = attn_flat.reshape(B, Hres // ws, Wres // ws, ws, ws, C)
    aw = aw.transpose(0, 1, 3, 2, 4, 5).reshape(B, Hres, Wres, C)
    if shift_size > 0:
        aw = jnp.roll(aw, shift=(shift_size, shift_size), axis=(1, 2))
    attn_branch = aw.reshape(B * L, C)
    shortcut = x.reshape(B * L, C)

    # ---- fused residual + LN2 + MLP + residual (token-tile grid) ----
    M = B * L
    M_pad = ((M + 127) // 128) * 128
    tm = 512
    while tm > M_pad or M_pad % tm:
        tm //= 2
    if M_pad // tm < 2 and tm >= 16:
        tm //= 2                       # keep >= 2 grid steps (megacore / pipelining)
    if M_pad != M:
        shortcut = jnp.pad(shortcut, ((0, M_pad - M), (0, 0)))
        attn_branch = jnp.pad(attn_branch, ((0, M_pad - M), (0, 0)))

    out2d = pl.pallas_call(
        functools.partial(_mlp_block_kernel, eps=1e-5),
        grid=(M_pad // tm,),
        in_specs=[
            pl.BlockSpec((tm, C), lambda i: (i, 0)),         # shortcut
            pl.BlockSpec((tm, C), lambda i: (i, 0)),         # attention branch
            pl.BlockSpec((1, C), lambda i: (0, 0)),          # LN2 weight
            pl.BlockSpec((1, C), lambda i: (0, 0)),          # LN2 bias
            pl.BlockSpec((C, hidden), lambda i: (0, 0)),     # fc1 weight [in,out]
            pl.BlockSpec((1, hidden), lambda i: (0, 0)),     # fc1 bias
            pl.BlockSpec((hidden, C), lambda i: (0, 0)),     # fc2 weight [in,out]
            pl.BlockSpec((1, C), lambda i: (0, 0)),          # fc2 bias
        ],
        out_specs=pl.BlockSpec((tm, C), lambda i: (i, 0)),
        out_shape=jax.ShapeDtypeStruct((M_pad, C), x.dtype),
        compiler_params=pltpu.CompilerParams(
            dimension_semantics=("parallel",),
            vmem_limit_bytes=32 * 1024 * 1024),
    )(shortcut, attn_branch,
      params["norm2_w"].reshape(1, C), params["norm2_b"].reshape(1, C),
      fc1_t, params["fc1_b"].reshape(1, hidden),
      fc2_t, params["fc2_b"].reshape(1, C))

    return out2d[:M].reshape(B, L, C)


# --------------------------------- main --------------------------------------

if __name__ == "__main__":
    # Small Swin config: dim=32, 8x8 feature map, 4x4 windows, shifted windows.
    B = 2
    H = W = 8
    C = 32
    num_heads = 4
    window_size = 4
    shift_size = 2
    mlp_ratio = 4.0
    L = H * W
    hidden = int(C * mlp_ratio)

    key = jax.random.PRNGKey(0)
    keys = jax.random.split(key, 9)
    bound_c = 1.0 / math.sqrt(C)
    bound_h = 1.0 / math.sqrt(hidden)

    x = jax.random.normal(keys[0], (B, L, C), dtype=jnp.float32)
    params = {
        "norm1_w": jnp.ones((C,), jnp.float32),
        "norm1_b": jnp.zeros((C,), jnp.float32),
        "qkv_w": jax.random.uniform(keys[1], (3 * C, C), minval=-bound_c,
                                    maxval=bound_c, dtype=jnp.float32),
        "proj_w": jax.random.uniform(keys[2], (C, C), minval=-bound_c,
                                     maxval=bound_c, dtype=jnp.float32),
        "proj_b": jax.random.uniform(keys[3], (C,), minval=-bound_c,
                                     maxval=bound_c, dtype=jnp.float32),
        "rpb_table": 0.02 * jax.random.normal(
            keys[4], ((2 * window_size - 1) ** 2, num_heads), dtype=jnp.float32),
        "norm2_w": jnp.ones((C,), jnp.float32),
        "norm2_b": jnp.zeros((C,), jnp.float32),
        "fc1_w": jax.random.uniform(keys[5], (hidden, C), minval=-bound_c,
                                    maxval=bound_c, dtype=jnp.float32),
        "fc1_b": jax.random.uniform(keys[6], (hidden,), minval=-bound_c,
                                    maxval=bound_c, dtype=jnp.float32),
        "fc2_w": jax.random.uniform(keys[7], (C, hidden), minval=-bound_h,
                                    maxval=bound_h, dtype=jnp.float32),
        "fc2_b": jax.random.uniform(keys[8], (C,), minval=-bound_h,
                                    maxval=bound_h, dtype=jnp.float32),
    }

    out = swin_transformer_block(
        x, params, input_resolution=(H, W), num_heads=num_heads,
        window_size=window_size, shift_size=shift_size, mlp_ratio=mlp_ratio)
    jax.block_until_ready(out)

    assert out.shape == (B, L, C)
    assert bool(jnp.all(jnp.isfinite(out)))
    print("KERNEL_OK")
</pallas_src>

<mosaic_0001>
module attributes {stable_mosaic.version = 11 : i64} {
  func.func @_window_attention_kernel(%arg0: i32, %arg1: memref<64x32xf32, #tpu.memory_space<vmem>>, %arg2: memref<1x32xf32, #tpu.memory_space<vmem>>, %arg3: memref<1x32xf32, #tpu.memory_space<vmem>>, %arg4: memref<32x32xbf16, #tpu.memory_space<vmem>>, %arg5: memref<32x32xbf16, #tpu.memory_space<vmem>>, %arg6: memref<32x32xbf16, #tpu.memory_space<vmem>>, %arg7: memref<4x8x32xbf16, #tpu.memory_space<vmem>>, %arg8: memref<1x32xf32, #tpu.memory_space<vmem>>, %arg9: memref<4x4x16x16xbf16, #tpu.memory_space<vmem>>, %arg10: memref<64x32xf32, #tpu.memory_space<vmem>>) attributes {dimension_semantics = [#tpu.dimension_semantics<parallel>], iteration_bounds = array<i64: 2>, scalar_prefetch = 0 : i64, scratch_operands = 0 : i64, tpu.core_type = #tpu.core_type<tc>, window_params = [{transform_indices = @transform_0, window_bounds = array<i64: 64, 32>}, {pipeline_mode = #tpu.pipeline_mode<synchronous>, transform_indices = @transform_1, window_bounds = array<i64: 1, 32>}, {pipeline_mode = #tpu.pipeline_mode<synchronous>, transform_indices = @transform_2, window_bounds = array<i64: 1, 32>}, {pipeline_mode = #tpu.pipeline_mode<synchronous>, transform_indices = @transform_3, window_bounds = array<i64: 32, 32>}, {pipeline_mode = #tpu.pipeline_mode<synchronous>, transform_indices = @transform_4, window_bounds = array<i64: 32, 32>}, {pipeline_mode = #tpu.pipeline_mode<synchronous>, transform_indices = @transform_5, window_bounds = array<i64: 32, 32>}, {pipeline_mode = #tpu.pipeline_mode<synchronous>, transform_indices = @transform_6, window_bounds = array<i64: 4, 8, 32>}, {pipeline_mode = #tpu.pipeline_mode<synchronous>, transform_indices = @transform_7, window_bounds = array<i64: 1, 32>}, {transform_indices = @transform_8, window_bounds = array<i64: 4, 4, 16, 16>}, {transform_indices = @transform_9, window_bounds = array<i64: 64, 32>}]} {
    %c0 = arith.constant 0 : index
    %c0_0 = arith.constant 0 : index
    %0 = vector.load %arg1[%c0, %c0_0] : memref<64x32xf32, #tpu.memory_space<vmem>>, vector<64x32xf32>
    %cst = arith.constant dense<0.000000e+00> : vector<64xf32>
    %1 = vector.multi_reduction <add>, %0, %cst [1] : vector<64x32xf32> to vector<64xf32>
    %2 = vector.shape_cast %1 : vector<64xf32> to vector<64x1xf32>
    %cst_1 = arith.constant 3.200000e+01 : f32
    %3 = vector.broadcast %cst_1 : f32 to vector<64x1xf32>
    %4 = arith.divf %2, %3 : vector<64x1xf32>
    %5 = vector.broadcast %4 : vector<64x1xf32> to vector<64x32xf32>
    %6 = arith.subf %0, %5 : vector<64x32xf32>
    %7 = arith.mulf %6, %6 : vector<64x32xf32>
    %cst_2 = arith.constant dense<0.000000e+00> : vector<64xf32>
    %8 = vector.multi_reduction <add>, %7, %cst_2 [1] : vector<64x32xf32> to vector<64xf32>
    %9 = vector.shape_cast %8 : vector<64xf32> to vector<64x1xf32>
    %cst_3 = arith.constant 3.200000e+01 : f32
    %10 = vector.broadcast %cst_3 : f32 to vector<64x1xf32>
    %11 = arith.divf %9, %10 : vector<64x1xf32>
    %12 = vector.broadcast %4 : vector<64x1xf32> to vector<64x32xf32>
    %13 = arith.subf %0, %12 : vector<64x32xf32>
    %cst_4 = arith.constant 9.99999974E-6 : f32
    %14 = vector.broadcast %cst_4 : f32 to vector<64x1xf32>
    %15 = arith.addf %11, %14 : vector<64x1xf32>
    %16 = math.rsqrt %15 : vector<64x1xf32>
    %17 = vector.broadcast %16 : vector<64x1xf32> to vector<64x32xf32>
    %18 = arith.mulf %13, %17 : vector<64x32xf32>
    %c0_5 = arith.constant 0 : index
    %c0_6 = arith.constant 0 : index
    %19 = vector.load %arg2[%c0_5, %c0_6] : memref<1x32xf32, #tpu.memory_space<vmem>>, vector<1x32xf32>
    %20 = vector.broadcast %19 : vector<1x32xf32> to vector<64x32xf32>
    %21 = arith.mulf %18, %20 : vector<64x32xf32>
    %c0_7 = arith.constant 0 : index
    %c0_8 = arith.constant 0 : index
    %22 = vector.load %arg3[%c0_7, %c0_8] : memref<1x32xf32, #tpu.memory_space<vmem>>, vector<1x32xf32>
    %23 = vector.broadcast %22 : vector<1x32xf32> to vector<64x32xf32>
    %24 = arith.addf %21, %23 : vector<64x32xf32>
    %25 = arith.truncf %24 : vector<64x32xf32> to vector<64x32xbf16>
    %c0_9 = arith.constant 0 : index
    %c0_10 = arith.constant 0 : index
    %26 = vector.load %arg4[%c0_9, %c0_10] : memref<32x32xbf16, #tpu.memory_space<vmem>>, vector<32x32xbf16>
    %cst_11 = arith.constant dense<0.000000e+00> : vector<64x32xf32>
    %27 = tpu.matmul %25, %26, %cst_11 {dimension_numbers = #tpu.dot_dimension_numbers<[1], [0], [0], [1], [0, 0, 1, 1], [], []>} : vector<64x32xbf16>, vector<32x32xbf16>, vector<64x32xf32> -> vector<64x32xf32>
    %cst_12 = arith.constant 0.353553385 : f32
    %28 = vector.broadcast %cst_12 : f32 to vector<64x32xf32>
    %29 = arith.mulf %27, %28 : vector<64x32xf32>
    %c0_13 = arith.constant 0 : index
    %c0_14 = arith.constant 0 : index
    %30 = vector.load %arg5[%c0_13, %c0_14] : memref<32x32xbf16, #tpu.memory_space<vmem>>, vector<32x32xbf16>
    %cst_15 = arith.constant dense<0.000000e+00> : vector<64x32xf32>
    %31 = tpu.matmul %25, %30, %cst_15 {dimension_numbers = #tpu.dot_dimension_numbers<[1], [0], [0], [1], [0, 0, 1, 1], [], []>} : vector<64x32xbf16>, vector<32x32xbf16>, vector<64x32xf32> -> vector<64x32xf32>
    %c0_16 = arith.constant 0 : index
    %c0_17 = arith.constant 0 : index
    %32 = vector.load %arg6[%c0_16, %c0_17] : memref<32x32xbf16, #tpu.memory_space<vmem>>, vector<32x32xbf16>
    %cst_18 = arith.constant dense<0.000000e+00> : vector<64x32xf32>
    %33 = tpu.matmul %25, %32, %cst_18 {dimension_numbers = #tpu.dot_dimension_numbers<[1], [0], [0], [1], [0, 0, 1, 1], [], []>} : vector<64x32xbf16>, vector<32x32xbf16>, vector<64x32xf32> -> vector<64x32xf32>
    %34 = vector.extract_strided_slice %29 {offsets = [0, 0], sizes = [64, 8], strides = [1, 1]} : vector<64x32xf32> to vector<64x8xf32>
    %35 = vector.extract_strided_slice %29 {offsets = [0, 8], sizes = [64, 8], strides = [1, 1]} : vector<64x32xf32> to vector<64x8xf32>
    %36 = vector.extract_strided_slice %29 {offsets = [0, 16], sizes = [64, 8], strides = [1, 1]} : vector<64x32xf32> to vector<64x8xf32>
    %37 = vector.extract_strided_slice %29 {offsets = [0, 24], sizes = [64, 8], strides = [1, 1]} : vector<64x32xf32> to vector<64x8xf32>
    %38 = vector.shape_cast %34 : vector<64x8xf32> to vector<1x64x8xf32>
    %39 = vector.shape_cast %35 : vector<64x8xf32> to vector<1x64x8xf32>
    %40 = vector.shape_cast %36 : vector<64x8xf32> to vector<1x64x8xf32>
    %41 = vector.shape_cast %37 : vector<64x8xf32> to vector<1x64x8xf32>
    %42 = tpu.concatenate %38, %39, %40, %41 in 0 : vector<1x64x8xf32>, vector<1x64x8xf32>, vector<1x64x8xf32>, vector<1x64x8xf32> -> vector<4x64x8xf32>
    %43 = vector.shape_cast %42 : vector<4x64x8xf32> to vector<16x16x8xf32>
    %44 = arith.truncf %43 : vector<16x16x8xf32> to vector<16x16x8xbf16>
    %45 = vector.extract_strided_slice %31 {offsets = [0, 0], sizes = [64, 8], strides = [1, 1]} : vector<64x32xf32> to vector<64x8xf32>
    %46 = vector.extract_strided_slice %31 {offsets = [0, 8], sizes = [64, 8], strides = [1, 1]} : vector<64x32xf32> to vector<64x8xf32>
    %47 = vector.extract_strided_slice %31 {offsets = [0, 16], sizes = [64, 8], strides = [1, 1]} : vector<64x32xf32> to vector<64x8xf32>
    %48 = vector.extract_strided_slice %31 {offsets = [0, 24], sizes = [64, 8], strides = [1, 1]} : vector<64x32xf32> to vector<64x8xf32>
    %49 = vector.shape_cast %45 : vector<64x8xf32> to vector<1x64x8xf32>
    %50 = vector.shape_cast %46 : vector<64x8xf32> to vector<1x64x8xf32>
    %51 = vector.shape_cast %47 : vector<64x8xf32> to vector<1x64x8xf32>
    %52 = vector.shape_cast %48 : vector<64x8xf32> to vector<1x64x8xf32>
    %53 = tpu.concatenate %49, %50, %51, %52 in 0 : vector<1x64x8xf32>, vector<1x64x8xf32>, vector<1x64x8xf32>, vector<1x64x8xf32> -> vector<4x64x8xf32>
    %54 = vector.shape_cast %53 : vector<4x64x8xf32> to vector<16x16x8xf32>
    %55 = arith.truncf %54 : vector<16x16x8xf32> to vector<16x16x8xbf16>
    %56 = vector.extract_strided_slice %33 {offsets = [0, 0], sizes = [64, 8], strides = [1, 1]} : vector<64x32xf32> to vector<64x8xf32>
    %57 = vector.extract_strided_slice %33 {offsets = [0, 8], sizes = [64, 8], strides = [1, 1]} : vector<64x32xf32> to vector<64x8xf32>
    %58 = vector.extract_strided_slice %33 {offsets = [0, 16], sizes = [64, 8], strides = [1, 1]} : vector<64x32xf32> to vector<64x8xf32>
    %59 = vector.extract_strided_slice %33 {offsets = [0, 24], sizes = [64, 8], strides = [1, 1]} : vector<64x32xf32> to vector<64x8xf32>
    %60 = vector.shape_cast %56 : vector<64x8xf32> to vector<1x64x8xf32>
    %61 = vector.shape_cast %57 : vector<64x8xf32> to vector<1x64x8xf32>
    %62 = vector.shape_cast %58 : vector<64x8xf32> to vector<1x64x8xf32>
    %63 = vector.shape_cast %59 : vector<64x8xf32> to vector<1x64x8xf32>
    %64 = tpu.concatenate %60, %61, %62, %63 in 0 : vector<1x64x8xf32>, vector<1x64x8xf32>, vector<1x64x8xf32>, vector<1x64x8xf32> -> vector<4x64x8xf32>
    %65 = vector.shape_cast %64 : vector<4x64x8xf32> to vector<16x16x8xf32>
    %66 = arith.truncf %65 : vector<16x16x8xf32> to vector<16x16x8xbf16>
    "tpu.trace_start"() <{level = 10 : i32, message = "bnd,bmd->bnm"}> : () -> ()
    %cst_19 = arith.constant dense<0.000000e+00> : vector<16x16x16xf32>
    %67 = tpu.matmul %44, %55, %cst_19 {dimension_numbers = #tpu.dot_dimension_numbers<[2], [2], [1], [1], [0, 0, 0, 1, 1, 1], [0], [0]>} : vector<16x16x8xbf16>, vector<16x16x8xbf16>, vector<16x16x16xf32> -> vector<16x16x16xf32>
    "tpu.trace_stop"() : () -> ()
    %c0_20 = arith.constant 0 : index
    %c0_21 = arith.constant 0 : index
    %c0_22 = arith.constant 0 : index
    %c0_23 = arith.constant 0 : index
    %68 = vector.load %arg9[%c0_20, %c0_21, %c0_22, %c0_23] : memref<4x4x16x16xbf16, #tpu.memory_space<vmem>>, vector<4x4x16x16xbf16>
    %69 = arith.extf %68 : vector<4x4x16x16xbf16> to vector<4x4x16x16xf32>
    %70 = vector.shape_cast %69 : vector<4x4x16x16xf32> to vector<16x16x16xf32>
    %71 = arith.addf %67, %70 : vector<16x16x16xf32>
    %cst_24 = arith.constant dense<0xFF800000> : vector<16x16xf32>
    %72 = vector.multi_reduction <maximumf>, %71, %cst_24 [2] : vector<16x16x16xf32> to vector<16x16xf32>
    %73 = vector.shape_cast %72 : vector<16x16xf32> to vector<16x16x1xf32>
    %74 = vector.broadcast %73 : vector<16x16x1xf32> to vector<16x16x16xf32>
    %75 = arith.subf %71, %74 : vector<16x16x16xf32>
    %76 = math.exp %75 : vector<16x16x16xf32>
    %cst_25 = arith.constant dense<0.000000e+00> : vector<16x16xf32>
    %77 = vector.multi_reduction <add>, %76, %cst_25 [2] : vector<16x16x16xf32> to vector<16x16xf32>
    %78 = vector.shape_cast %77 : vector<16x16xf32> to vector<16x16x1xf32>
    %79 = tpu.reciprocal %78 {approx = true} : vector<16x16x1xf32> -> vector<16x16x1xf32>
    %80 = vector.broadcast %79 : vector<16x16x1xf32> to vector<16x16x16xf32>
    %81 = arith.mulf %76, %80 : vector<16x16x16xf32>
    %82 = arith.truncf %81 : vector<16x16x16xf32> to vector<16x16x16xbf16>
    "tpu.trace_start"() <{level = 10 : i32, message = "bnm,bmd->bnd"}> : () -> ()
    %cst_26 = arith.constant dense<0.000000e+00> : vector<16x16x8xf32>
    %83 = tpu.matmul %82, %66, %cst_26 {dimension_numbers = #tpu.dot_dimension_numbers<[2], [1], [1], [2], [0, 0, 0, 1, 1, 2], [0], [0]>} : vector<16x16x16xbf16>, vector<16x16x8xbf16>, vector<16x16x8xf32> -> vector<16x16x8xf32>
    "tpu.trace_stop"() : () -> ()
    %84 = vector.shape_cast %83 : vector<16x16x8xf32> to vector<4x64x8xf32>
    %85 = arith.truncf %84 : vector<4x64x8xf32> to vector<4x64x8xbf16>
    %cst_27 = arith.constant 0.000000e+00 : f32
    %86 = vector.broadcast %cst_27 : f32 to vector<64x32xf32>
    %87 = vector.extract_strided_slice %85 {offsets = [0, 0, 0], sizes = [1, 64, 8], strides = [1, 1, 1]} : vector<4x64x8xbf16> to vector<1x64x8xbf16>
    %88 = vector.shape_cast %87 : vector<1x64x8xbf16> to vector<64x8xbf16>
    %c0_28 = arith.constant 0 : index
    %c0_29 = arith.constant 0 : index
    %c0_30 = arith.constant 0 : index
    %89 = vector.load %arg7[%c0_28, %c0_29, %c0_30] : memref<4x8x32xbf16, #tpu.memory_space<vmem>>, vector<1x8x32xbf16>
    %90 = vector.shape_cast %89 : vector<1x8x32xbf16> to vector<8x32xbf16>
    %cst_31 = arith.constant dense<0.000000e+00> : vector<64x32xf32>
    %91 = tpu.matmul %88, %90, %cst_31 {dimension_numbers = #tpu.dot_dimension_numbers<[1], [0], [0], [1], [0, 0, 1, 1], [], []>} : vector<64x8xbf16>, vector<8x32xbf16>, vector<64x32xf32> -> vector<64x32xf32>
    %92 = arith.addf %86, %91 : vector<64x32xf32>
    %93 = vector.extract_strided_slice %85 {offsets = [1, 0, 0], sizes = [1, 64, 8], strides = [1, 1, 1]} : vector<4x64x8xbf16> to vector<1x64x8xbf16>
    %94 = vector.shape_cast %93 : vector<1x64x8xbf16> to vector<64x8xbf16>
    %c1 = arith.constant 1 : index
    %c0_32 = arith.constant 0 : index
    %c0_33 = arith.constant 0 : index
    %95 = vector.load %arg7[%c1, %c0_32, %c0_33] : memref<4x8x32xbf16, #tpu.memory_space<vmem>>, vector<1x8x32xbf16>
    %96 = vector.shape_cast %95 : vector<1x8x32xbf16> to vector<8x32xbf16>
    %cst_34 = arith.constant dense<0.000000e+00> : vector<64x32xf32>
    %97 = tpu.matmul %94, %96, %cst_34 {dimension_numbers = #tpu.dot_dimension_numbers<[1], [0], [0], [1], [0, 0, 1, 1], [], []>} : vector<64x8xbf16>, vector<8x32xbf16>, vector<64x32xf32> -> vector<64x32xf32>
    %98 = arith.addf %92, %97 : vector<64x32xf32>
    %99 = vector.extract_strided_slice %85 {offsets = [2, 0, 0], sizes = [1, 64, 8], strides = [1, 1, 1]} : vector<4x64x8xbf16> to vector<1x64x8xbf16>
    %100 = vector.shape_cast %99 : vector<1x64x8xbf16> to vector<64x8xbf16>
    %c2 = arith.constant 2 : index
    %c0_35 = arith.constant 0 : index
    %c0_36 = arith.constant 0 : index
    %101 = vector.load %arg7[%c2, %c0_35, %c0_36] : memref<4x8x32xbf16, #tpu.memory_space<vmem>>, vector<1x8x32xbf16>
    %102 = vector.shape_cast %101 : vector<1x8x32xbf16> to vector<8x32xbf16>
    %cst_37 = arith.constant dense<0.000000e+00> : vector<64x32xf32>
    %103 = tpu.matmul %100, %102, %cst_37 {dimension_numbers = #tpu.dot_dimension_numbers<[1], [0], [0], [1], [0, 0, 1, 1], [], []>} : vector<64x8xbf16>, vector<8x32xbf16>, vector<64x32xf32> -> vector<64x32xf32>
    %104 = arith.addf %98, %103 : vector<64x32xf32>
    %105 = vector.extract_strided_slice %85 {offsets = [3, 0, 0], sizes = [1, 64, 8], strides = [1, 1, 1]} : vector<4x64x8xbf16> to vector<1x64x8xbf16>
    %106 = vector.shape_cast %105 : vector<1x64x8xbf16> to vector<64x8xbf16>
    %c3 = arith.constant 3 : index
    %c0_38 = arith.constant 0 : index
    %c0_39 = arith.constant 0 : index
    %107 = vector.load %arg7[%c3, %c0_38, %c0_39] : memref<4x8x32xbf16, #tpu.memory_space<vmem>>, vector<1x8x32xbf16>
    %108 = vector.shape_cast %107 : vector<1x8x32xbf16> to vector<8x32xbf16>
    %cst_40 = arith.constant dense<0.000000e+00> : vector<64x32xf32>
    %109 = tpu.matmul %106, %108, %cst_40 {dimension_numbers = #tpu.dot_dimension_numbers<[1], [0], [0], [1], [0, 0, 1, 1], [], []>} : vector<64x8xbf16>, vector<8x32xbf16>, vector<64x32xf32> -> vector<64x32xf32>
    %110 = arith.addf %104, %109 : vector<64x32xf32>
    %c0_41 = arith.constant 0 : index
    %c0_42 = arith.constant 0 : index
    %111 = vector.load %arg8[%c0_41, %c0_42] : memref<1x32xf32, #tpu.memory_space<vmem>>, vector<1x32xf32>
    %112 = vector.broadcast %111 : vector<1x32xf32> to vector<64x32xf32>
    %113 = arith.addf %110, %112 : vector<64x32xf32>
    %c0_43 = arith.constant 0 : index
    %c0_44 = arith.constant 0 : index
    %114 = vector.load %arg10[%c0_43, %c0_44] : memref<64x32xf32, #tpu.memory_space<vmem>>, vector<64x32xf32>
    tpu.vector_store %arg10[%c0_43, %c0_44], %113 {strides = array<i32>} : memref<64x32xf32, #tpu.memory_space<vmem>>, vector<64x32xf32>,
    return
  }
  func.func @transform_0(%arg0: i32) -> (i32, i32) {
    %c0_i32 = arith.constant 0 : i32
    %c0_i32_0 = arith.constant 0 : i32
    return %arg0, %c0_i32 : i32, i32
  }
  func.func @transform_1(%arg0: i32) -> (i32, i32) {
    %c0_i32 = arith.constant 0 : i32
    %c0_i32_0 = arith.constant 0 : i32
    %c0_i32_1 = arith.constant 0 : i32
    return %c0_i32, %c0_i32_0 : i32, i32
  }
  func.func @transform_2(%arg0: i32) -> (i32, i32) {
    %c0_i32 = arith.constant 0 : i32
    %c0_i32_0 = arith.constant 0 : i32
    %c0_i32_1 = arith.constant 0 : i32
    return %c0_i32, %c0_i32_0 : i32, i32
  }
  func.func @transform_3(%arg0: i32) -> (i32, i32) {
    %c0_i32 = arith.constant 0 : i32
    %c0_i32_0 = arith.constant 0 : i32
    %c0_i32_1 = arith.constant 0 : i32
    return %c0_i32, %c0_i32_0 : i32, i32
  }
  func.func @transform_4(%arg0: i32) -> (i32, i32) {
    %c0_i32 = arith.constant 0 : i32
    %c0_i32_0 = arith.constant 0 : i32
    %c0_i32_1 = arith.constant 0 : i32
    return %c0_i32, %c0_i32_0 : i32, i32
  }
  func.func @transform_5(%arg0: i32) -> (i32, i32) {
    %c0_i32 = arith.constant 0 : i32
    %c0_i32_0 = arith.constant 0 : i32
    %c0_i32_1 = arith.constant 0 : i32
    return %c0_i32, %c0_i32_0 : i32, i32
  }
  func.func @transform_6(%arg0: i32) -> (i32, i32, i32) {
    %c0_i32 = arith.constant 0 : i32
    %c0_i32_0 = arith.constant 0 : i32
    %c0_i32_1 = arith.constant 0 : i32
    %c0_i32_2 = arith.constant 0 : i32
    return %c0_i32, %c0_i32_0, %c0_i32_1 : i32, i32, i32
  }
  func.func @transform_7(%arg0: i32) -> (i32, i32) {
    %c0_i32 = arith.constant 0 : i32
    %c0_i32_0 = arith.constant 0 : i32
    %c0_i32_1 = arith.constant 0 : i32
    return %c0_i32, %c0_i32_0 : i32, i32
  }
  func.func @transform_8(%arg0: i32) -> (i32, i32, i32, i32) {
    %c1_i32 = arith.constant 1 : i32
    %c0_i32 = arith.constant 0 : i32
    %0 = arith.cmpi eq, %c1_i32, %c0_i32 : i32
    %c1_i32_0 = arith.constant 1 : i32
    %1 = arith.select %0, %c1_i32_0, %c1_i32 : i32
    %2 = arith.remsi %arg0, %1 : i32
    %c0_i32_1 = arith.constant 0 : i32
    %3 = arith.cmpi ne, %2, %c0_i32_1 : i32
    %c0_i32_2 = arith.constant 0 : i32
    %4 = arith.cmpi slt, %2, %c0_i32_2 : i32
    %c0_i32_3 = arith.constant 0 : i32
    %5 = arith.cmpi slt, %1, %c0_i32_3 : i32
    %6 = arith.xori %4, %5 : i1
    %7 = arith.andi %6, %3 : i1
    %8 = arith.addi %2, %1 : i32
    %9 = arith.select %7, %8, %2 : i32
    %c0_i32_4 = arith.constant 0 : i32
    %c0_i32_5 = arith.constant 0 : i32
    %c0_i32_6 = arith.constant 0 : i32
    %c0_i32_7 = arith.constant 0 : i32
    return %c0_i32_4, %9, %c0_i32_5, %c0_i32_6 : i32, i32, i32, i32
  }
  func.func @transform_9(%arg0: i32) -> (i32, i32) {
    %c0_i32 = arith.constant 0 : i32
    %c0_i32_0 = arith.constant 0 : i32
    return %arg0, %c0_i32 : i32, i32
  }
}

</mosaic_0001>

<bundles_post_ra>
// kernel: tpu_custom_call.1
= control target key start
LH: loop header
LB: loop body
LE: loop exit
PB: predicated region body
PF: predicated region fallthrough
CT: control target
= control target key end

     0   :  { %14 = vsyncpa [#allocation3], 0  ;;  %s5319_s0 = inlined_call_operand.vmem [shape: f32[128,32], index: 0, kind: input, shape index: {}]   ;;  %s5320_s1 = inlined_call_operand.vmem [shape: f32[1,32], index: 1, kind: input, shape index: {}]   ;;  %s5321_s2 = inlined_call_operand.vmem [shape: f32[1,32], index: 2, kind: input, shape index: {}]   ;;  %s5322_s3 = inlined_call_operand.vmem [shape: bf16[32,32], index: 3, kind: input, shape index: {}]   ;;  %s5323_s4 = inlined_call_operand.vmem [shape: bf16[32,32], index: 4, kind: input, shape index: {}]   ;;  %s5324_s5 = inlined_call_operand.hbm [shape: bf16[32,32], index: 5, kind: input, shape index: {}]   ;;  %s5325_s6 = inlined_call_operand.hbm [shape: bf16[4,8,32], index: 6, kind: input, shape index: {}]   ;;  %s5326_s7 = inlined_call_operand.vmem [shape: f32[1,32], index: 7, kind: input, shape index: {}]   ;;  %s5327_s8 = inlined_call_operand.vmem [shape: bf16[4,4,16,16], index: 8, kind: input, shape index: {}]   ;;  %s5328_s9 = inlined_call_operand.vmem [shape: f32[128,32], index: 9, kind: output, shape index: {}]  }
   0x1   :  { %15 = vsyncpa [#allocation5], 0  ;;  %s4447_s30 = smov 0  }
   0x2 LB: > { %s3417_s10 = sadd.s32 4294967295, %s4386_s30   ;;  %p3419_p0 = scmp.ge.s32.totalorder %s4386_s30, 1  ;;  %s4386_s30 = sphi %s4447_s30, %s21_s30  }
   0x3   : > { %p246_p1 = scmp.lt.s32.totalorder %s4386_s30, 3  ;;  %s4388_s11 = smov [#allocation2]  }
   0x4   : > { %s270_s12 = sshll.u32 %s4388_s11, 4  ;;  %p4461_p3 = scmp.eq.s32.totalorder %s3417_s10, 0  ;;  %s271_s12 = int_to_ptr.vmem [resolvable:$true] %s270_s12 }
   0x5   : > { %p4455_p2 = pnand %p3419_p0, %p246_p1  ;;  %s4389_s15 = smov [#allocation4]  }
   0x6   : > { %s283_s16 = sshll.u32 %s4389_s15, 4  ;;  %s4331_s18 = scalar_lea.vmem %s271_s12, 256  ;;  %s284_s16 = int_to_ptr.vmem [resolvable:$true] %s283_s16 }
   0x7   : > { %p3962_p4 = pneg %p4455_p2  ;;  %p4332_p7 = scmp.ne.s32.totalorder %s271_s12, %s4331_s18 }
   0x8   : > { %p4339_p10 = scmp.lt.s32.totalorder %s271_s12, %s271_s12  ;;  %p4340_p11 = scmp.lt.s32.totalorder %s4331_s18, %s4331_s18 }
   0x9   : > { %p4469_p5 = pnand %p4461_p3, %p3962_p4 }
   0xa   : > { %p4341_p12 = por %p4340_p11, %p4339_p10 }
   0xb   : > { %p4322_p6 = pneg %p4469_p5 }
   0xd   : > { %p4334_p8 = pnand %p4332_p7, %p4322_p6 }
   0xf   : > { %p4335_p9 = pneg %p4334_p8 }
  0x11   : > { %p4342_p13 = pnand %p4341_p12, %p4335_p9 }
  0x13   : > { %4345 = shalt.err (!%p4342_p13)
}
  0x14   : > { %s4390_s19 = smov 64   ;;  %s4391_s20 = smov 4  }
  0x15   : > { %3965 = dma.hbm_to_vmem [thread:$0]  (!%p4469_p5), %s5324_s5, 256, %s271_s12, [#allocation3], %s4390_s19, %s4390_s19, %s4391_s20  }
  0x16   : > { %s4357_s23 = scalar_lea.vmem %s284_s16, 256  ;;  %p4365_p7 = scmp.lt.s32.totalorder %s284_s16, %s284_s16 }
  0x17   : > { %p4358_p0 = scmp.ne.s32.totalorder %s284_s16, %s4357_s23  ;;  %p4366_p8 = scmp.lt.s32.totalorder %s4357_s23, %s4357_s23 }
  0x19   : > { %p4360_p1 = pnand %p4358_p0, %p4322_p6  ;;  %p4367_p10 = por %p4366_p8, %p4365_p7 }
  0x1b   : > { %p4361_p4 = pneg %p4360_p1 }
  0x1d   : > { %p4368_p9 = pnand %p4367_p10, %p4361_p4 }
  0x1f   : > { %4371 = shalt.err (!%p4368_p9)
}
  0x20   : > { %3968 = dma.hbm_to_vmem [thread:$0]  (!%p4469_p5), %s5325_s6, 256, %s284_s16, [#allocation5], %s4390_s19, %s4390_s19, %s4391_s20  }
  0x21   : > { %314 = sbr.rel (%p4455_p2) target bundleno = 1701 (0x6a5), region = 56 }
  0x26   : > { %4377 = dma.done.wait (%p4461_p3), [#allocation3], 256  }
  0x27   : > { %4379 = vsyncadd (%p4461_p3), [#allocation3], 4294967040 }
  0x28   : > { %4381 = dma.done.wait (%p4461_p3), [#allocation5], 256  }
  0x29   : > { %4383 = vsyncadd (%p4461_p3), [#allocation5], 4294967040  ;;  %s3426_s26 = sshll.u32 %s3417_s10, 3  ;;  %vm375_vm0 = vcmask 261120   ;;  %v4170_v56 = vld [vmem:[%s5322_s3 + $0x8] sm:$0xff]   ;;  %v4172_v58 = vld [vmem:[%s5322_s3] sm:$0xff]  }
  0x2a   : > { %p355_p6 = scmp.lt.s32.totalorder %s3426_s26, 15  ;;  %v4171_v57 = vld [vmem:[%s5323_s4 + $0x8] sm:$0xff]   ;;  %3682 = vmatprep.subr.bf16.mxu0 %v4170_v56  ;;  %v4173_v59 = vld [vmem:[%s5323_s4] sm:$0xff]   ;;  %vm4393_vm1 = vmmov 0   ;;  %s4394_s23 = smov 120   ;;  %vm1130_vm2 = vcmask 64512  }
  0x2b   : > { %3694 = vmatprep.subr.bf16.mxu1 %v4171_v57  ;;  %3683 = vmatpush3.bf16.msra.mxu0 %v4170_v56  ;;  %v4571_v60 = vld [vmem:[#allocation2 + $0x8] sm:$0xff]   ;;  %s4395_s24 = smov 112   ;;  %s4396_s25 = smov 104   ;;  %vm1883_vm3 = vcmask 130048   ;;  %vm2987_vm4 = vcmask 1043456  }
  0x2c   : > { %s5333_s26 = smov (!%p355_p6, %s3426_s26), 15  ;;  %3695 = vmatpush3.bf16.msra.mxu1 %v4171_v57  ;;  %3684 = vmatprep.subr.bf16.mxu0 %v4172_v58 }
  0x2d   : > { %s3427_s27 = sshll.u32 %s5333_s26, 3  ;;  %3696 = vmatprep.subr.bf16.mxu1 %v4173_v59 }
  0x2e   : > { %s358_s11 = scalar_lea.vmem %s5319_s0, %s3427_s27 }
  0x2f   : > { %v367_v0 = vld [vmem:[%s358_s11] sm:$0xff]  ;;  %v369_v1 = vld [vmem:[%s358_s11 + $0x10] sm:$0xff]  ;;  %v368_v2 = vld [vmem:[%s358_s11 + $0x8] sm:$0xff]  ;;  %3685 = vmatpush3.bf16.msra.mxu0 %v4172_v58 }
  0x30   : > { %v376_v3 = vsel %vm375_vm0, %v367_v0, 0.0  ;;  %v382_v4 = vsel %vm375_vm0, %v369_v1, 0.0  ;;  %v370_v5 = vld [vmem:[%s358_s11 + $0x18] sm:$0xff]  ;;  %v379_v6 = vsel %vm375_vm0, %v368_v2, 0.0  ;;  %v371_v7 = vld [vmem:[%s358_s11 + $0x20] sm:$0xff]  ;;  %v372_v9 = vld [vmem:[%s358_s11 + $0x28] sm:$0xff]  ;;  %3697 = vmatpush3.bf16.msra.mxu1 %v4173_v59  ;;  %3706 = vmatprep.subr.bf16.mxu0 %v4571_v60 }
  0x31   : > { %377 = vadd.xlane.f32.xlu0 %v376_v3  ;;  %383 = vadd.xlane.f32.xlu1 %v382_v4  ;;  %v385_v8 = vsel %vm375_vm0, %v370_v5, 0.0  ;;  %v388_v10 = vsel %vm375_vm0, %v371_v7, 0.0  ;;  %v391_v11 = vsel %vm375_vm0, %v372_v9, 0.0  ;;  %v373_v12 = vld [vmem:[%s358_s11 + $0x30] sm:$0xff]  ;;  %v374_v13 = vld [vmem:[%s358_s11 + $0x38] sm:$0xff]  ;;  %s5298_s11 = scalar_lea.vmem %s5328_s9, %s3427_s27 }
  0x32   : > { %v394_v14 = vsel %vm375_vm0, %v373_v12, 0.0  ;;  %v397_v15 = vsel %vm375_vm0, %v374_v13, 0.0 }
  0x35   : > { %380 = vadd.xlane.f32.xlu0 %v379_v6  ;;  %386 = vadd.xlane.f32.xlu1 %v385_v8 }
  0x39   : > { %389 = vadd.xlane.f32.xlu0 %v388_v10  ;;  %392 = vadd.xlane.f32.xlu1 %v391_v11 }
  0x3d   : > { %395 = vadd.xlane.f32.xlu0 %v394_v14  ;;  %398 = vadd.xlane.f32.xlu1 %v397_v15 }
  0xba   : > { %v378_v16 = vpop.xlane.xlu0 %377  ;;  %v384_v17 = vpop.xlane.xlu1 %383 }
  0xbb   : > { %v401_v18 = vmul.f32 0.03125, %v378_v16  ;;  %v403_v19 = vmul.f32 0.03125, %v384_v17 }
  0xbd   : > { %v4519_v20 = vsub.f32 %v367_v0, %v401_v18  ;;  %v4521_v21 = vsub.f32 %v369_v1, %v403_v19 }
  0xbe   : > { %v381_v22 = vpop.xlane.xlu0 %380  ;;  %v387_v23 = vpop.xlane.xlu1 %386 }
  0xbf   : > { %v402_v24 = vmul.f32 0.03125, %v381_v22  ;;  %v404_v25 = vmul.f32 0.03125, %v387_v23  ;;  %v417_v26 = vmul.f32 %v4519_v20, %v4519_v20  ;;  %v419_v27 = vmul.f32 %v4521_v21, %v4521_v21 }
  0xc1   : > { %v4527_v28 = vsub.f32 %v368_v2, %v402_v24  ;;  %v4529_v29 = vsub.f32 %v370_v5, %v404_v25  ;;  %v425_v30 = vsel %vm375_vm0, %v417_v26, 0.0  ;;  %v431_v33 = vsel %vm375_vm0, %v419_v27, 0.0  ;;  %v3430_v25 = vld [vmem:[%s5320_s1] ss:$0 sm:$0xff] }
  0xc2   : > { %426 = vadd.xlane.f32.xlu0 %v425_v30  ;;  %v390_v31 = vpop.xlane.xlu0 %389  ;;  %v393_v32 = vpop.xlane.xlu1 %392 }
  0xc3   : > { %v405_v34 = vmul.f32 0.03125, %v390_v31  ;;  %v406_v35 = vmul.f32 0.03125, %v393_v32  ;;  %v418_v36 = vmul.f32 %v4527_v28, %v4527_v28  ;;  %v420_v37 = vmul.f32 %v4529_v29, %v4529_v29  ;;  %v3431_v32 = vld [vmem:[%s5321_s2] ss:$0 sm:$0xff] }
  0xc5   : > { %v4537_v38 = vsub.f32 %v371_v7, %v405_v34  ;;  %v4539_v39 = vsub.f32 %v372_v9, %v406_v35  ;;  %v428_v40 = vsel %vm375_vm0, %v418_v36, 0.0  ;;  %v434_v43 = vsel %vm375_vm0, %v420_v37, 0.0 }
  0xc6   : > { %432 = vadd.xlane.f32.xlu0 %v431_v33  ;;  %429 = vadd.xlane.f32.xlu1 %v428_v40  ;;  %v396_v41 = vpop.xlane.xlu0 %395  ;;  %v399_v42 = vpop.xlane.xlu1 %398 }
  0xc7   : > { %v407_v44 = vmul.f32 0.03125, %v396_v41  ;;  %v408_v45 = vmul.f32 0.03125, %v399_v42  ;;  %v421_v46 = vmul.f32 %v4537_v38, %v4537_v38  ;;  %v422_v47 = vmul.f32 %v4539_v39, %v4539_v39 }
  0xc9   : > { %v4547_v48 = vsub.f32 %v373_v12, %v407_v44  ;;  %v4549_v49 = vsub.f32 %v374_v13, %v408_v45  ;;  %v437_v50 = vsel %vm375_vm0, %v421_v46, 0.0  ;;  %v440_v51 = vsel %vm375_vm0, %v422_v47, 0.0 }
  0xca   : > { %435 = vadd.xlane.f32.xlu1 %v434_v43  ;;  %438 = vadd.xlane.f32.xlu0 %v437_v50 }
  0xcb   : > { %v423_v52 = vmul.f32 %v4547_v48, %v4547_v48  ;;  %v424_v53 = vmul.f32 %v4549_v49, %v4549_v49 }
  0xcd   : > { %v443_v54 = vsel %vm375_vm0, %v423_v52, 0.0  ;;  %v446_v55 = vsel %vm375_vm0, %v424_v53, 0.0  ;;  %v4175_v53 = vld [vmem:[#allocation2] sm:$0xff]  }
  0xce   : > { %441 = vadd.xlane.f32.xlu1 %v440_v51  ;;  %444 = vadd.xlane.f32.xlu0 %v443_v54 }
  0xd2   : > { %447 = vadd.xlane.f32.xlu1 %v446_v55 }
 0x14b   : > { %v427_v61 = vpop.xlane.xlu0 %426 }
 0x14c   : > { %v449_v62 = vmul.f32 0.03125, %v427_v61 }
 0x14e   : > { %v457_v63 = vadd.f32 1e-05, %v449_v62 }
 0x14f   : > { %v430_v0 = vpop.xlane.xlu1 %429  ;;  %v433_v1 = vpop.xlane.xlu0 %432 }
 0x150   : > { %4176 = vrsqrt.f32 %v457_v63  ;;  %v450_v2 = vmul.f32 0.03125, %v430_v0  ;;  %v451_v3 = vmul.f32 0.03125, %v433_v1 }
 0x152   : > { %v458_v4 = vadd.f32 1e-05, %v450_v2  ;;  %v459_v5 = vadd.f32 1e-05, %v451_v3 }
 0x153   : > { %v436_v6 = vpop.xlane.xlu1 %435  ;;  %v439_v7 = vpop.xlane.xlu0 %438 }
 0x154   : > { %4178 = vrsqrt.f32 %v458_v4  ;;  %v452_v8 = vmul.f32 0.03125, %v436_v6  ;;  %v453_v9 = vmul.f32 0.03125, %v439_v7 }
 0x155   : > { %4180 = vrsqrt.f32 %v459_v5 }
 0x156   : > { %v460_v10 = vadd.f32 1e-05, %v452_v8  ;;  %v461_v11 = vadd.f32 1e-05, %v453_v9 }
 0x157   : > { %v442_v12 = vpop.xlane.xlu1 %441  ;;  %v445_v13 = vpop.xlane.xlu0 %444 }
 0x158   : > { %4182 = vrsqrt.f32 %v460_v10  ;;  %v454_v14 = vmul.f32 0.03125, %v442_v12  ;;  %v455_v15 = vmul.f32 0.03125, %v445_v13 }
 0x159   : > { %4184 = vrsqrt.f32 %v461_v11 }
 0x15a   : > { %v462_v16 = vadd.f32 1e-05, %v454_v14  ;;  %v463_v17 = vadd.f32 1e-05, %v455_v15 }
 0x15b   : > { %v448_v18 = vpop.xlane.xlu1 %447 }
 0x15c   : > { %4186 = vrsqrt.f32 %v462_v16  ;;  %v456_v19 = vmul.f32 0.03125, %v448_v18 }
 0x15d   : > { %v4177_v22 = vpop.eup %4176  ;;  %4188 = vrsqrt.f32 %v463_v17 }
 0x15e   : > { %v464_v23 = vadd.f32 1e-05, %v456_v19  ;;  %v473_v24 = vmul.f32 %v4177_v22, %v4519_v20 }
 0x160   : > { %4190 = vrsqrt.f32 %v464_v23  ;;  %v488_v31 = vmul.f32 %v3430_v25, %v473_v24 }
 0x161   : > { %v4179_v26 = vpop.eup %4178 }
 0x162   : > { %v4181_v27 = vpop.eup %4180  ;;  %v474_v30 = vmul.f32 %v4179_v26, %v4527_v28  ;;  %v503_v20 = vadd.f32 %v3431_v32, %v488_v31 }
 0x163   : > { %v475_v33 = vmul.f32 %v4181_v27, %v4521_v21 }
 0x164   : > { %v489_v34 = vmul.f32 %v3430_v25, %v474_v30 }
 0x165   : > { %v4183_v35 = vpop.eup %4182  ;;  %v490_v41 = vmul.f32 %v3430_v25, %v475_v33 }
 0x166   : > { %v4185_v36 = vpop.eup %4184  ;;  %v504_v37 = vadd.f32 %v3431_v32, %v489_v34  ;;  %v476_v40 = vmul.f32 %v4183_v35, %v4529_v29 }
 0x167   : > { %v477_v42 = vmul.f32 %v4185_v36, %v4537_v38  ;;  %v505_v21 = vadd.f32 %v3431_v32, %v490_v41 }
 0x168   : > { %v511_v43 = vpack.c.bf16 %v504_v37, %v503_v20  ;;  %v491_v44 = vmul.f32 %v3430_v25, %v476_v40 }
 0x169   : > { %v4187_v28 = vpop.eup %4186  ;;  %v492_v45 = vmul.f32 %v3430_v25, %v477_v42 }
 0x16a   : > { %v4189_v46 = vpop.eup %4188  ;;  %3686 = vmatprep.mubr.msk.bf16.mxu0 %vm375_vm0, %v511_v43  ;;  %3698 = vmatprep.mubr.msk.bf16.mxu1 %vm375_vm0, %v511_v43  ;;  %v506_v47 = vadd.f32 %v3431_v32, %v491_v44  ;;  %v478_v50 = vmul.f32 %v4187_v28, %v4539_v39 }
 0x16b   : > { %v479_v51 = vmul.f32 %v4189_v46, %v4547_v48  ;;  %v507_v38 = vadd.f32 %v3431_v32, %v492_v45 }
 0x16c   : > { %v512_v52 = vpack.c.bf16 %v506_v47, %v505_v21  ;;  %v493_v29 = vmul.f32 %v3430_v25, %v478_v50 }
 0x16d   : > { %v4191_v54 = vpop.eup %4190  ;;  %v494_v57 = vmul.f32 %v3430_v25, %v479_v51 }
 0x16e   : > { %3687 = vmatmul.mubr.msk.bf16.vlgmr.msra.gmra.mxu0 %vm375_vm0, %v512_v52  ;;  %3699 = vmatmul.mubr.msk.bf16.vlgmr.msra.gmra.mxu1 %vm375_vm0, %v512_v52  ;;  %v508_v55 = vadd.f32 %v3431_v32, %v493_v29  ;;  %v480_v56 = vmul.f32 %v4191_v54, %v4549_v49  ;;  %v4392_v49 = vmov 0.0  }
 0x16f   : > { %3707 = vmatpush3.bf16.msra.mxu0 %v4571_v60  ;;  %v509_v39 = vadd.f32 %v3431_v32, %v494_v57  ;;  %3718 = vmatprep.subr.bf16.mxu1 %v4392_v49 }
 0x170   : > { %v513_v58 = vpack.c.bf16 %v508_v55, %v507_v38  ;;  %v495_v59 = vmul.f32 %v3430_v25, %v480_v56  ;;  %3708 = vmatprep.subr.bf16.mxu0 %v4175_v53 }
 0x172   : > { %3690 = vmatprep.mubr.msk.bf16.mxu0 %vm375_vm0, %v513_v58  ;;  %3702 = vmatprep.mubr.msk.bf16.mxu1 %vm375_vm0, %v513_v58  ;;  %v510_v48 = vadd.f32 %v3431_v32, %v495_v59 }
 0x173   : > { %3709 = vmatpush3.bf16.msra.mxu0 %v4175_v53 }
 0x174   : > { %v514_v61 = vpack.c.bf16 %v510_v48, %v509_v39  ;;  %3730 = vmatprep.subr.bf16.mxu0 %v4392_v49 }
 0x176   : > { %3691 = vmatmul.mubr.msk.bf16.gmra.mxu0 %vm375_vm0, %v514_v61  ;;  %3703 = vmatmul.mubr.msk.bf16.gmra.mxu1 %vm375_vm0, %v514_v61 }
 0x177   : > { %3710 = vmatprep.mubr.msk.bf16.mxu0 %vm375_vm0, %v511_v43  ;;  %3720 = vmatprep.mubr.msk.bf16.mxu1 %vm4393_vm1, %v4392_v49 }
 0x17e   : > { %3711 = vmatmul.mubr.msk.bf16.vlgmr.msra.gmra.mxu0 %vm375_vm0, %v512_v52 }
 0x17f   : > { %3714 = vmatprep.mubr.msk.bf16.mxu0 %vm375_vm0, %v513_v58 }
 0x186   : > { %3715 = vmatmul.mubr.msk.bf16.gmra.mxu0 %vm375_vm0, %v514_v61 }
 0x187   : > { %3732 = vmatprep.mubr.msk.bf16.mxu0 %vm4393_vm1, %v4392_v49 }
 0x22e   : > { %v3688_v60 = vpop.f32.mrf.mxu0  ;;  %v3700_v62 = vpop.f32.mrf.mxu1 }
 0x22f   : > { %v610_v13 = vmul.f32 0.35355338, %v3688_v60 }
 0x230   : > { %v577_v63 = vpop.f32.mrf.mxu0  ;;  %v666_v0 = vpop.f32.mrf.mxu1 }
 0x231   : > { %v608_v4 = vmul.f32 0.35355338, %v577_v63 }
 0x232   : > { %v3689_v1 = vpop.f32.mrf.mxu0  ;;  %v3701_v2 = vpop.f32.mrf.mxu1 }
 0x233   : > { %v4607_v3 = vpack.i.bf16 %v3701_v2, %v3700_v62  ;;  %v611_v7 = vmul.f32 0.35355338, %v3689_v1  ;;  %v955_v23 = vpack.c.bf16 %v3701_v2, %v3700_v62 }
 0x234   : > { %v580_v5 = vpop.f32.mrf.mxu0  ;;  %v669_v6 = vpop.f32.mrf.mxu1 }
 0x235   : > { %v609_v8 = vmul.f32 0.35355338, %v580_v5  ;;  %3996 = vrot.lane.b32.xlu1 %v4607_v3, %s4394_s23  ;;  %v4611_v9 = vpack.i.bf16 %v669_v6, %v666_v0  ;;  %v954_v10 = vpack.c.bf16 %v669_v6, %v666_v0  ;;  %v4620_v18 = vpack.i.bf16 %v611_v7, %v610_v13 }
 0x236   : > { %v3692_v11 = vpop.f32.mrf.mxu0  ;;  %v3704_v12 = vpop.f32.mrf.mxu1  ;;  %v1182_v35 = vsel %vm1130_vm2, %v955_v23, 0  ;;  %v859_v21 = vpack.c.bf16 %v611_v7, %v610_v13 }
 0x237   : > { %3991 = vrot.lane.b32.xlu0 %v4611_v9, %s4394_s23  ;;  %v1135_v14 = vsel %vm1130_vm2, %v954_v10, 0  ;;  %v4616_v15 = vpack.i.bf16 %v609_v8, %v608_v4  ;;  %v858_v24 = vpack.c.bf16 %v609_v8, %v608_v4  ;;  %v614_v40 = vmul.f32 0.35355338, %v3692_v11 }
 0x238   : > { %v593_v16 = vpop.f32.mrf.mxu0  ;;  %v682_v17 = vpop.f32.mrf.mxu1  ;;  %3719 = vmatpush3.bf16.xpose.msra.mxu1 %v1135_v14 }
 0x239   : > { %4006 = vrot.lane.b32.xlu1 %v4616_v15, %s4394_s23  ;;  %3724 = vmatprep.subr.bf16.mxu1 %v4392_v49  ;;  %v612_v27 = vmul.f32 0.35355338, %v593_v16 }
 0x23a   : > { %v3693_v19 = vpop.f32.mrf.mxu0  ;;  %v3705_v22 = vpop.f32.mrf.mxu1 }
 0x23b   : > { %4001 = vrot.lane.b32.xlu0 %v4620_v18, %s4394_s23  ;;  %v615_v34 = vmul.f32 0.35355338, %v3693_v19  ;;  %v4015_v41 = vpack.i.bf16 %v3705_v22, %v3704_v12  ;;  %v957_v45 = vpack.c.bf16 %v3705_v22, %v3704_v12 }
 0x23c   : > { %v596_v25 = vpop.f32.mrf.mxu0  ;;  %v685_v26 = vpop.f32.mrf.mxu1 }
 0x23d   : > { %v613_v30 = vmul.f32 0.35355338, %v596_v25  ;;  %v4010_v31 = vpack.i.bf16 %v685_v26, %v682_v17  ;;  %v956_v32 = vpack.c.bf16 %v685_v26, %v682_v17  ;;  %v4030_v28 = vpack.i.bf16 %v615_v34, %v614_v40 }
 0x23e   : > { %v4625_v33 = vpop.f32.mrf.mxu0  ;;  %v1276_v29 = vsel %vm1130_vm2, %v957_v45, 0  ;;  %v861_v56 = vpack.c.bf16 %v615_v34, %v614_v40 }
 0x23f   : > { %3721 = vmatmul.mubr.msk.bf16.vlgmr.msra.gmra.mxu1 %vm1130_vm2, %v858_v24  ;;  %4011 = vrot.lane.b32.xlu1 %v4010_v31, %s4394_s23  ;;  %v1229_v36 = vsel %vm1130_vm2, %v956_v32, 0  ;;  %v4025_v20 = vpack.i.bf16 %v613_v30, %v612_v27  ;;  %v860_v51 = vpack.c.bf16 %v613_v30, %v612_v27 }
 0x240   : > { %v4631_v37 = vpop.f32.mrf.mxu0  ;;  %3725 = vmatpush3.bf16.xpose.msra.mxu1 %v1182_v35  ;;  %3731 = vmatpush3.bf16.xpose.msra.mxu0 %v1229_v36 }
 0x241   : > { %4026 = vrot.lane.b32.xlu0 %v4025_v20, %s4394_s23  ;;  %3726 = vmatprep.mubr.msk.bf16.mxu1 %vm4393_vm1, %v4392_v49 }
 0x242   : > { %v4636_v42 = vpop.f32.mrf.mxu0  ;;  %3736 = vmatprep.subr.bf16.mxu1 %v4392_v49  ;;  %3742 = vmatprep.subr.bf16.mxu0 %v4392_v49 }
 0x243   : > { %v4642_v43 = vpack.i.bf16 %v4636_v42, %v4625_v33  ;;  %v1051_v44 = vpack.c.bf16 %v4636_v42, %v4625_v33  ;;  %4016 = vrot.lane.b32.xlu1 %v4015_v41, %s4394_s23  ;;  %v3565_v33 = vld [vmem:[%s5327_s8 + $0x8] sm:$0xff]  }
 0x244   : > { %v4647_v46 = vpop.f32.mrf.mxu0 }
 0x245   : > { %v1050_v47 = vpack.c.bf16 %v4647_v46, %v4631_v37  ;;  %4031 = vrot.lane.b32.xlu0 %v4030_v28, %s4394_s23  ;;  %v4654_v50 = vpack.i.bf16 %v4647_v46, %v4631_v37  ;;  %v3502_v37 = vld [vmem:[%s5327_s8] sm:$0xff]  }
 0x246   : > { %v4656_v52 = vpop.f32.mrf.mxu0  ;;  %v3503_v46 = vunpack.c.l.bf16 %v3502_v37 }
 0x247   : > { %3727 = vmatmul.mubr.msk.bf16.vlgmr.msra.gmra.mxu1 %vm1130_vm2, %v859_v21  ;;  %4021 = vrot.lane.b32.xlu1 %v4611_v9, %s4395_s24 }
 0x248   : > { %3733 = vmatmul.mubr.msk.bf16.vlgmr.msra.gmra.mxu0 %vm1130_vm2, %v860_v51  ;;  %v4663_v53 = vpop.f32.mrf.mxu0  ;;  %3737 = vmatpush3.bf16.xpose.msra.mxu1 %v1276_v29 }
 0x249   : > { %4041 = vrot.lane.b32.xlu0 %v4616_v15, %s4395_s24  ;;  %3738 = vmatprep.mubr.msk.bf16.mxu1 %vm4393_vm1, %v4392_v49 }
 0x24a   : > { %v4669_v54 = vpop.f32.mrf.mxu0  ;;  %3748 = vmatprep.subr.bf16.mxu1 %v4392_v49  ;;  %3744 = vmatprep.mubr.msk.bf16.mxu0 %vm4393_vm1, %v4392_v49 }
 0x24b   : > { %v4676_v38 = vpack.i.bf16 %v4669_v54, %v4656_v52  ;;  %v1053_v55 = vpack.c.bf16 %v4669_v54, %v4656_v52  ;;  %4036 = vrot.lane.b32.xlu1 %v4607_v3, %s4395_s24 }
 0x24c   : > { %v4709_v57 = vpop.f32.mrf.mxu0 }
 0x24d   : > { %4051 = vrot.lane.b32.xlu0 %v4620_v18, %s4395_s24  ;;  %v4717_v58 = vpack.i.bf16 %v4709_v57, %v4663_v53 }
 0x24f   : > { %4046 = vrot.lane.b32.xlu1 %v4010_v31, %s4395_s24  ;;  %3739 = vmatmul.mubr.msk.bf16.vlgmr.msra.gmra.mxu1 %vm1130_vm2, %v861_v56 }
 0x250   : > { %3750 = vmatprep.mubr.msk.bf16.mxu1 %vm4393_vm1, %v4392_v49 }
 0x251   : > { %4066 = vrot.lane.b32.xlu0 %v4025_v20, %s4395_s24 }
 0x253   : > { %4056 = vrot.lane.b32.xlu1 %v4015_v41, %s4395_s24 }
 0x255   : > { %4071 = vrot.lane.b32.xlu0 %v4030_v28, %s4395_s24 }
 0x257   : > { %4061 = vrot.lane.b32.xlu1 %v4611_v9, %s4396_s25 }
 0x259   : > { %4081 = vrot.lane.b32.xlu0 %v4616_v15, %s4396_s25 }
 0x25b   : > { %4076 = vrot.lane.b32.xlu1 %v4607_v3, %s4396_s25 }
 0x25d   : > { %4091 = vrot.lane.b32.xlu0 %v4620_v18, %s4396_s25 }
 0x25f   : > { %4086 = vrot.lane.b32.xlu1 %v4010_v31, %s4396_s25 }
 0x261   : > { %4101 = vrot.lane.b32.xlu0 %v4025_v20, %s4396_s25 }
 0x263   : > { %4096 = vrot.lane.b32.xlu1 %v4015_v41, %s4396_s25 }
 0x265   : > { %4116 = vrot.lane.b32.xlu0 %v4642_v43, %s4395_s24 }
 0x267   : > { %4106 = vrot.lane.b32.xlu1 %v4030_v28, %s4396_s25 }
 0x269   : > { %4121 = vrot.lane.b32.xlu0 %v4654_v50, %s4394_s23 }
 0x26b   : > { %4111 = vrot.lane.b32.xlu1 %v4642_v43, %s4394_s23 }
 0x26d   : > { %4126 = vrot.lane.b32.xlu0 %v4654_v50, %s4395_s24 }
 0x26f   : > { %4131 = vrot.lane.b32.xlu1 %v4676_v38, %s4394_s23 }
 0x271   : > { %4136 = vrot.lane.b32.xlu0 %v4717_v58, %s4394_s23 }
 0x2a7   : > { %v3997_v59 = vpop.permute.xlu1 %3996 }
 0x2a8   : > { %v3999_v39 = vunpack.i.h.bf16 %v3997_v59  ;;  %v3998_v48 = vunpack.i.l.bf16 %v3997_v59 }
 0x2a9   : > { %v3992_v61 = vpop.permute.xlu0 %3991 }
 0x2aa   : > { %v3994_v60 = vunpack.i.h.bf16 %v3992_v61  ;;  %v3993_v62 = vunpack.i.l.bf16 %v3992_v61  ;;  %v959_v63 = vpack.c.bf16 %v3999_v39, %v3998_v48 }
 0x2ab   : > { %v4007_v2 = vpop.permute.xlu1 %4006 }
 0x2ac   : > { %v958_v0 = vpack.c.bf16 %v3994_v60, %v3993_v62  ;;  %v1370_v1 = vsel %vm1130_vm2, %v959_v63, 0  ;;  %v4009_v7 = vunpack.i.h.bf16 %v4007_v2  ;;  %v4008_v8 = vunpack.i.l.bf16 %v4007_v2 }
 0x2ad   : > { %3749 = vmatpush3.bf16.xpose.msra.mxu1 %v1370_v1  ;;  %v4002_v3 = vpop.permute.xlu0 %4001 }
 0x2ae   : > { %v4004_v4 = vunpack.i.h.bf16 %v4002_v3  ;;  %v4003_v5 = vunpack.i.l.bf16 %v4002_v3  ;;  %v1323_v6 = vsel %vm1130_vm2, %v958_v0, 0  ;;  %3760 = vmatprep.subr.bf16.mxu1 %v4392_v49  ;;  %v862_v14 = vpack.c.bf16 %v4009_v7, %v4008_v8 }
 0x2af   : > { %3743 = vmatpush3.bf16.xpose.msra.mxu0 %v1323_v6 }
 0x2b0   : > { %3754 = vmatprep.subr.bf16.mxu0 %v4392_v49  ;;  %v863_v10 = vpack.c.bf16 %v4004_v4, %v4003_v5 }
 0x2b1   : > { %v4012_v9 = vpop.permute.xlu1 %4011 }
 0x2b2   : > { %v4014_v11 = vunpack.i.h.bf16 %v4012_v9  ;;  %v4013_v12 = vunpack.i.l.bf16 %v4012_v9 }
 0x2b3   : > { %v4027_v13 = vpop.permute.xlu0 %4026 }
 0x2b4   : > { %v960_v15 = vpack.c.bf16 %v4014_v11, %v4013_v12  ;;  %3751 = vmatmul.mubr.msk.bf16.vlgmr.msra.gmra.mxu1 %vm1130_vm2, %v863_v10  ;;  %v4029_v23 = vunpack.i.h.bf16 %v4027_v13  ;;  %v4028_v24 = vunpack.i.l.bf16 %v4027_v13 }
 0x2b5   : > { %v4017_v16 = vpop.permute.xlu1 %4016  ;;  %3762 = vmatprep.mubr.msk.bf16.mxu1 %vm4393_vm1, %v4392_v49 }
 0x2b6   : > { %v4019_v17 = vunpack.i.h.bf16 %v4017_v16  ;;  %v4018_v18 = vunpack.i.l.bf16 %v4017_v16  ;;  %3745 = vmatmul.mubr.msk.bf16.vlgmr.msra.gmra.mxu0 %vm1130_vm2, %v862_v14  ;;  %v1417_v19 = vsel %vm1130_vm2, %v960_v15, 0  ;;  %v864_v34 = vpack.c.bf16 %v4029_v23, %v4028_v24 }
 0x2b7   : > { %v4032_v22 = vpop.permute.xlu0 %4031  ;;  %3755 = vmatpush3.bf16.xpose.msra.mxu0 %v1417_v19  ;;  %3756 = vmatprep.mubr.msk.bf16.mxu0 %vm4393_vm1, %v4392_v49 }
 0x2b8   : > { %v961_v25 = vpack.c.bf16 %v4019_v17, %v4018_v18  ;;  %3766 = vmatprep.subr.bf16.mxu0 %v4392_v49  ;;  %v4034_v35 = vunpack.i.h.bf16 %v4032_v22  ;;  %v4033_v36 = vunpack.i.l.bf16 %v4032_v22 }
 0x2b9   : > { %v4022_v26 = vpop.permute.xlu1 %4021 }
 0x2ba   : > { %v4024_v27 = vunpack.i.h.bf16 %v4022_v26  ;;  %v4023_v30 = vunpack.i.l.bf16 %v4022_v26  ;;  %v1464_v31 = vsel %vm1130_vm2, %v961_v25, 0  ;;  %v865_v51 = vpack.c.bf16 %v4034_v35, %v4033_v36 }
 0x2bb   : > { %v4042_v32 = vpop.permute.xlu0 %4041  ;;  %3761 = vmatpush3.bf16.xpose.msra.mxu1 %v1464_v31 }
 0x2bc   : > { %v962_v20 = vpack.c.bf16 %v4024_v27, %v4023_v30  ;;  %3772 = vmatprep.subr.bf16.mxu1 %v4392_v49  ;;  %v4044_v29 = vunpack.i.h.bf16 %v4042_v32  ;;  %v4043_v56 = vunpack.i.l.bf16 %v4042_v32 }
 0x2bd   : > { %v4037_v40 = vpop.permute.xlu1 %4036 }
 0x2be   : > { %v4039_v41 = vunpack.i.h.bf16 %v4037_v40  ;;  %v4038_v28 = vunpack.i.l.bf16 %v4037_v40  ;;  %3757 = vmatmul.mubr.msk.bf16.vlgmr.msra.gmra.mxu0 %vm1130_vm2, %v864_v34  ;;  %v1511_v45 = vsel %vm1130_vm2, %v962_v20, 0  ;;  %v866_v63 = vpack.c.bf16 %v4044_v29, %v4043_v56 }
 0x2bf   : > { %v4052_v21 = vpop.permute.xlu0 %4051  ;;  %3767 = vmatpush3.bf16.xpose.msra.mxu0 %v1511_v45  ;;  %3768 = vmatprep.mubr.msk.bf16.mxu0 %vm4393_vm1, %v4392_v49 }
 0x2c0   : > { %v963_v59 = vpack.c.bf16 %v4039_v41, %v4038_v28  ;;  %3778 = vmatprep.subr.bf16.mxu0 %v4392_v49  ;;  %v4054_v0 = vunpack.i.h.bf16 %v4052_v21  ;;  %v4053_v1 = vunpack.i.l.bf16 %v4052_v21 }
 0x2c1   : > { %v4047_v39 = vpop.permute.xlu1 %4046 }
 0x2c2   : > { %v4049_v48 = vunpack.i.h.bf16 %v4047_v39  ;;  %v4048_v61 = vunpack.i.l.bf16 %v4047_v39  ;;  %3763 = vmatmul.mubr.msk.bf16.vlgmr.msra.gmra.mxu1 %vm1130_vm2, %v865_v51  ;;  %v1558_v60 = vsel %vm1130_vm2, %v963_v59, 0  ;;  %v867_v8 = vpack.c.bf16 %v4054_v0, %v4053_v1 }
 0x2c3   : > { %v4067_v62 = vpop.permute.xlu0 %4066  ;;  %3773 = vmatpush3.bf16.xpose.msra.mxu1 %v1558_v60  ;;  %3774 = vmatprep.mubr.msk.bf16.mxu1 %vm4393_vm1, %v4392_v49 }
 0x2c4   : > { %v964_v2 = vpack.c.bf16 %v4049_v48, %v4048_v61  ;;  %3784 = vmatprep.subr.bf16.mxu1 %v4392_v49  ;;  %v4069_v9 = vunpack.i.h.bf16 %v4067_v62  ;;  %v4068_v10 = vunpack.i.l.bf16 %v4067_v62 }
 0x2c5   : > { %v4057_v3 = vpop.permute.xlu1 %4056 }
 0x2c6   : > { %v4059_v4 = vunpack.i.h.bf16 %v4057_v3  ;;  %v4058_v5 = vunpack.i.l.bf16 %v4057_v3  ;;  %3769 = vmatmul.mubr.msk.bf16.vlgmr.msra.gmra.mxu0 %vm1130_vm2, %v866_v63  ;;  %v1605_v6 = vsel %vm1130_vm2, %v964_v2, 0  ;;  %v868_v17 = vpack.c.bf16 %v4069_v9, %v4068_v10 }
 0x2c7   : > { %v4072_v7 = vpop.permute.xlu0 %4071  ;;  %3779 = vmatpush3.bf16.xpose.msra.mxu0 %v1605_v6  ;;  %3780 = vmatprep.mubr.msk.bf16.mxu0 %vm4393_vm1, %v4392_v49  ;;  %v3504_v6 = vunpack.c.h.bf16 %v3502_v37  ;;  %v3507_v10 = vunpack.c.l.bf16 %v3565_v33 }
 0x2c8   : > { %v965_v11 = vpack.c.bf16 %v4059_v4, %v4058_v5  ;;  %3790 = vmatprep.subr.bf16.mxu0 %v4392_v49  ;;  %v4074_v18 = vunpack.i.h.bf16 %v4072_v7  ;;  %v4073_v19 = vunpack.i.l.bf16 %v4072_v7 }
 0x2c9   : > { %v4062_v12 = vpop.permute.xlu1 %4061 }
 0x2ca   : > { %v4064_v13 = vunpack.i.h.bf16 %v4062_v12  ;;  %v4063_v14 = vunpack.i.l.bf16 %v4062_v12  ;;  %3775 = vmatmul.mubr.msk.bf16.vlgmr.msra.gmra.mxu1 %vm1130_vm2, %v867_v8  ;;  %v1652_v15 = vsel %vm1130_vm2, %v965_v11, 0  ;;  %v869_v30 = vpack.c.bf16 %v4074_v18, %v4073_v19  ;;  %v3566_v8 = vld [vmem:[%s5327_s8 + $0x10] sm:$0xff]  }
 0x2cb   : > { %v4082_v16 = vpop.permute.xlu0 %4081  ;;  %3785 = vmatpush3.bf16.xpose.msra.mxu1 %v1652_v15  ;;  %3786 = vmatprep.mubr.msk.bf16.mxu1 %vm4393_vm1, %v4392_v49  ;;  %v3512_v18 = vunpack.c.h.bf16 %v3566_v8 }
 0x2cc   : > { %v966_v22 = vpack.c.bf16 %v4064_v13, %v4063_v14  ;;  %3796 = vmatprep.subr.bf16.mxu1 %v4392_v49  ;;  %v4084_v31 = vunpack.i.h.bf16 %v4082_v16  ;;  %v4083_v32 = vunpack.i.l.bf16 %v4082_v16  ;;  %v3511_v13 = vunpack.c.l.bf16 %v3566_v8 }
 0x2cd   : > { %v4077_v23 = vpop.permute.xlu1 %4076 }
 0x2ce   : > { %v4079_v24 = vunpack.i.h.bf16 %v4077_v23  ;;  %v4078_v25 = vunpack.i.l.bf16 %v4077_v23  ;;  %3781 = vmatmul.mubr.msk.bf16.vlgmr.msra.gmra.mxu0 %vm1130_vm2, %v868_v17  ;;  %v1699_v26 = vsel %vm1130_vm2, %v966_v22, 0  ;;  %v870_v41 = vpack.c.bf16 %v4084_v31, %v4083_v32 }
 0x2cf   : > { %v4092_v27 = vpop.permute.xlu0 %4091  ;;  %3791 = vmatpush3.bf16.xpose.msra.mxu0 %v1699_v26  ;;  %3792 = vmatprep.mubr.msk.bf16.mxu0 %vm4393_vm1, %v4392_v49  ;;  %v3508_v23 = vunpack.c.h.bf16 %v3565_v33  ;;  %v3567_v26 = vld [vmem:[%s5327_s8 + $0x18] sm:$0xff]  }
 0x2d0   : > { %v967_v34 = vpack.c.bf16 %v4079_v24, %v4078_v25  ;;  %3802 = vmatprep.subr.bf16.mxu0 %v4392_v49  ;;  %v4094_v28 = vunpack.i.h.bf16 %v4092_v27  ;;  %v4093_v45 = vunpack.i.l.bf16 %v4092_v27 }
 0x2d1   : > { %v4087_v35 = vpop.permute.xlu1 %4086 }
 0x2d2   : > { %v4089_v36 = vunpack.i.h.bf16 %v4087_v35  ;;  %v4088_v20 = vunpack.i.l.bf16 %v4087_v35  ;;  %3787 = vmatmul.mubr.msk.bf16.vlgmr.msra.gmra.mxu1 %vm1130_vm2, %v869_v30  ;;  %v1746_v40 = vsel %vm1130_vm2, %v967_v34, 0  ;;  %v871_v48 = vpack.c.bf16 %v4094_v28, %v4093_v45 }
 0x2d3   : > { %3797 = vmatpush3.bf16.xpose.msra.mxu1 %v1746_v40  ;;  %3798 = vmatprep.mubr.msk.bf16.mxu1 %vm4393_vm1, %v4392_v49  ;;  %v4102_v51 = vpop.permute.xlu0 %4101  ;;  %v3515_v35 = vunpack.c.l.bf16 %v3567_v26 }
 0x2d4   : > { %v968_v21 = vpack.c.bf16 %v4089_v36, %v4088_v20  ;;  %3808 = vmatprep.subr.bf16.mxu1 %v4392_v49  ;;  %v4104_v61 = vunpack.i.h.bf16 %v4102_v51  ;;  %v4103_v60 = vunpack.i.l.bf16 %v4102_v51 }
 0x2d5   : > { %v4097_v29 = vpop.permute.xlu1 %4096 }
 0x2d6   : > { %v4099_v56 = vunpack.i.h.bf16 %v4097_v29  ;;  %v4098_v59 = vunpack.i.l.bf16 %v4097_v29  ;;  %3793 = vmatmul.mubr.msk.bf16.vlgmr.msra.gmra.mxu0 %vm1130_vm2, %v870_v41  ;;  %v1793_v39 = vsel %vm1130_vm2, %v968_v21, 0  ;;  %v872_v1 = vpack.c.bf16 %v4104_v61, %v4103_v60  ;;  %v3568_v61 = vld [vmem:[%s5327_s8 + $0x20] sm:$0xff]  }
 0x2d7   : > { %3803 = vmatpush3.bf16.xpose.msra.mxu0 %v1793_v39  ;;  %3804 = vmatprep.mubr.msk.bf16.mxu0 %vm4393_vm1, %v4392_v49  ;;  %v3516_v41 = vunpack.c.h.bf16 %v3567_v26 }
 0x2d8   : > { %v969_v62 = vpack.c.bf16 %v4099_v56, %v4098_v59  ;;  %3814 = vmatprep.subr.bf16.mxu0 %v4392_v49 }
 0x2d9   : > { %v4107_v63 = vpop.permute.xlu1 %4106 }
 0x2da   : > { %3799 = vmatmul.mubr.msk.bf16.vlgmr.msra.gmra.mxu1 %vm1130_vm2, %v871_v48  ;;  %v1840_v0 = vsel %vm1130_vm2, %v969_v62, 0  ;;  %v4109_v2 = vunpack.i.h.bf16 %v4107_v63  ;;  %v4108_v3 = vunpack.i.l.bf16 %v4107_v63  ;;  %v3569_v48 = vld [vmem:[%s5327_s8 + $0x28] sm:$0xff]   ;;  %v3519_v62 = vunpack.c.l.bf16 %v3568_v61 }
 0x2db   : > { %3809 = vmatpush3.bf16.xpose.msra.mxu1 %v1840_v0  ;;  %3810 = vmatprep.mubr.msk.bf16.mxu1 %vm4393_vm1, %v4392_v49  ;;  %v3523_v60 = vunpack.c.l.bf16 %v3569_v48 }
 0x2dc   : > { %3820 = vmatprep.subr.bf16.mxu1 %v4392_v49  ;;  %v873_v4 = vpack.c.bf16 %v4109_v2, %v4108_v3 }
 0x2de   : > { %3805 = vmatmul.mubr.msk.bf16.vlgmr.msra.gmra.mxu0 %vm1130_vm2, %v872_v1  ;;  %v3524_v1 = vunpack.c.h.bf16 %v3569_v48 }
 0x2df   : > { %3815 = vmatpush3.bf16.msra.mxu0 %v1050_v47  ;;  %3816 = vmatprep.mubr.msk.bf16.mxu0 %vm4393_vm1, %v4392_v49 }
 0x2e0   : > { %3826 = vmatprep.subr.bf16.mxu0 %v4392_v49 }
 0x2e2   : > { %3811 = vmatmul.mubr.msk.bf16.vlgmr.msra.gmra.mxu1 %vm1130_vm2, %v873_v4 }
 0x2e3   : > { %3821 = vmatpush3.bf16.msra.mxu1 %v1051_v44  ;;  %3822 = vmatprep.mubr.msk.bf16.mxu1 %vm4393_vm1, %v4392_v49 }
 0x2e4   : > { %3832 = vmatprep.subr.bf16.mxu1 %v4392_v49 }
 0x2ff   : > { %v1171_v47 = vpop.f32.mrf.mxu1 }
 0x300   : > { %v4792_v5 = vadd.f32 %v3503_v46, %v1171_v47  ;;  %v3520_v46 = vunpack.c.h.bf16 %v3568_v61 }
 0x301   : > { %v3722_v7 = vpop.f32.mrf.mxu1 }
 0x302   : > { %v1884_v42 = vsel %vm1883_vm3, %v4792_v5, -inf }
 0x303   : > { %v1174_v44 = vpop.f32.mrf.mxu1  ;;  %1885 = vmax.xlane.f32.xlu0 %v1884_v42 }
 0x304   : > { %v4802_v9 = vadd.f32 %v3504_v6, %v1174_v44 }
 0x305   : > { %v3723_v11 = vpop.f32.mrf.mxu1 }
 0x306   : > { %v1887_v12 = vsel %vm1883_vm3, %v4802_v9, -inf }
 0x307   : > { %v1218_v14 = vpop.f32.mrf.mxu1  ;;  %1888 = vmax.xlane.f32.xlu1 %v1887_v12  ;;  %v3571_v12 = vld [vmem:[%s5327_s8 + $0x38] sm:$0xff]  }
 0x308   : > { %v4806_v15 = vadd.f32 %v3507_v10, %v1218_v14  ;;  %v1265_v16 = vpop.f32.mrf.mxu0  ;;  %v3570_v14 = vld [vmem:[%s5327_s8 + $0x30] sm:$0xff]  }
 0x309   : > { %v3728_v17 = vpop.f32.mrf.mxu1  ;;  %v4808_v19 = vadd.f32 %v3511_v13, %v1265_v16  ;;  %v4856_v13 = vpop.permute.xlu0 %4116 }
 0x30a   : > { %v3734_v22 = vpop.f32.mrf.mxu0  ;;  %v1890_v24 = vsel %vm1883_vm3, %v4806_v15, -inf }
 0x30b   : > { %v1221_v25 = vpop.f32.mrf.mxu1  ;;  %1891 = vmax.xlane.f32.xlu0 %v1890_v24  ;;  %v1896_v36 = vsel %vm1883_vm3, %v4808_v19, -inf }
 0x30c   : > { %v1268_v27 = vpop.f32.mrf.mxu0  ;;  %v4817_v32 = vadd.f32 %v3508_v23, %v1221_v25  ;;  %v3527_v23 = vunpack.c.l.bf16 %v3570_v14 }
 0x30d   : > { %v4815_v30 = vadd.f32 %v3512_v18, %v1268_v27  ;;  %v3729_v31 = vpop.f32.mrf.mxu1  ;;  %v3531_v18 = vunpack.c.l.bf16 %v3571_v12  ;;  %v4863_v26 = vpop.permute.xlu0 %4121 }
 0x30e   : > { %v3735_v34 = vpop.f32.mrf.mxu0  ;;  %v1893_v21 = vsel %vm1883_vm3, %v4817_v32, -inf  ;;  %v3532_v31 = vunpack.c.h.bf16 %v3571_v12 }
 0x30f   : > { %v1312_v20 = vpop.f32.mrf.mxu1  ;;  %1897 = vmax.xlane.f32.xlu0 %v1896_v36  ;;  %v1899_v40 = vsel %vm1883_vm3, %v4815_v30, -inf  ;;  %v3573_v36 = vld [vmem:[%s5327_s8 + $0x48] sm:$0xff]  }
 0x310   : > { %1900 = vmax.xlane.f32.xlu1 %v1899_v40  ;;  %v4823_v45 = vadd.f32 %v3515_v35, %v1312_v20  ;;  %v3528_v40 = vunpack.c.h.bf16 %v3570_v14 }
 0x311   : > { %v3740_v28 = vpop.f32.mrf.mxu1  ;;  %v4879_v61 = vpop.permute.xlu0 %4126 }
 0x312   : > { %v1902_v59 = vsel %vm1883_vm3, %v4823_v45, -inf }
 0x313   : > { %v1315_v51 = vpop.f32.mrf.mxu1  ;;  %1894 = vmax.xlane.f32.xlu0 %v1893_v21  ;;  %v3572_v21 = vld [vmem:[%s5327_s8 + $0x40] sm:$0xff]  }
 0x314   : > { %v4827_v29 = vadd.f32 %v3516_v41, %v1315_v51 }
 0x315   : > { %v3741_v56 = vpop.f32.mrf.mxu1  ;;  %v4898_v14 = vpop.permute.xlu0 %4136 }
 0x316   : > { %v1905_v39 = vsel %vm1883_vm3, %v4827_v29, -inf }
 0x317   : > { %1903 = vmax.xlane.f32.xlu0 %v1902_v59  ;;  %1906 = vmax.xlane.f32.xlu1 %v1905_v39  ;;  %v3539_v59 = vunpack.c.l.bf16 %v3573_v36 }
 0x374   : > { %v1406_v63 = vpop.f32.mrf.mxu1 }
 0x375   : > { %v4839_v0 = vadd.f32 %v3523_v60, %v1406_v63 }
 0x376   : > { %v1359_v2 = vpop.f32.mrf.mxu0  ;;  %v3752_v3 = vpop.f32.mrf.mxu1 }
 0x377   : > { %v4841_v4 = vadd.f32 %v3519_v62, %v1359_v2  ;;  %v1914_v37 = vsel %vm1883_vm3, %v4839_v0, -inf  ;;  %v3535_v62 = vunpack.c.l.bf16 %v3572_v21 }
 0x378   : > { %1915 = vmax.xlane.f32.xlu0 %v1914_v37  ;;  %v3746_v47 = vpop.f32.mrf.mxu0  ;;  %v1409_v6 = vpop.f32.mrf.mxu1 }
 0x379   : > { %v4845_v7 = vadd.f32 %v3524_v1, %v1409_v6  ;;  %v1908_v10 = vsel %vm1883_vm3, %v4841_v4, -inf  ;;  %v3540_v47 = vunpack.c.h.bf16 %v3573_v36 }
 0x37a   : > { %v1362_v33 = vpop.f32.mrf.mxu0  ;;  %v3753_v42 = vpop.f32.mrf.mxu1 }
 0x37b   : > { %v4847_v44 = vadd.f32 %v3520_v46, %v1362_v33  ;;  %v1917_v8 = vsel %vm1883_vm3, %v4845_v7, -inf }
 0x37c   : > { %1918 = vmax.xlane.f32.xlu1 %v1917_v8  ;;  %1909 = vmax.xlane.f32.xlu0 %v1908_v10  ;;  %v3747_v11 = vpop.f32.mrf.mxu0  ;;  %v3575_v10 = vld [vmem:[%s5327_s8 + $0x58] sm:$0xff]  }
 0x37d   : > { %v1911_v17 = vsel %vm1883_vm3, %v4847_v44, -inf  ;;  %v3536_v11 = vunpack.c.h.bf16 %v3572_v21 }
 0x37e   : > { %v1453_v16 = vpop.f32.mrf.mxu0 }
 0x37f   : > { %v4870_v20 = vadd.f32 %v3527_v23, %v1453_v16  ;;  %v3547_v23 = vunpack.c.l.bf16 %v3575_v10 }
 0x380   : > { %1912 = vmax.xlane.f32.xlu1 %v1911_v17  ;;  %v3758_v22 = vpop.f32.mrf.mxu0  ;;  %v3574_v17 = vld [vmem:[%s5327_s8 + $0x50] sm:$0xff]  }
 0x381   : > { %v1920_v1 = vsel %vm1883_vm3, %v4870_v20, -inf }
 0x382   : > { %v1456_v24 = vpop.f32.mrf.mxu0  ;;  %v1500_v25 = vpop.f32.mrf.mxu1 }
 0x383   : > { %v4865_v27 = vadd.f32 %v3531_v18, %v1500_v25  ;;  %v4881_v60 = vadd.f32 %v3528_v40, %v1456_v24 }
 0x384   : > { %v3759_v34 = vpop.f32.mrf.mxu0  ;;  %v3764_v35 = vpop.f32.mrf.mxu1 }
 0x385   : > { %v1926_v41 = vsel %vm1883_vm3, %v4865_v27, -inf  ;;  %v1923_v8 = vsel %vm1883_vm3, %v4881_v60, -inf  ;;  %v3543_v34 = vunpack.c.l.bf16 %v3574_v17 }
 0x386   : > { %v1503_v28 = vpop.f32.mrf.mxu1  ;;  %1927 = vmax.xlane.f32.xlu0 %v1926_v41  ;;  %v1547_v51 = vpop.f32.mrf.mxu0 }
 0x387   : > { %v4877_v56 = vadd.f32 %v3532_v31, %v1503_v28  ;;  %v4889_v6 = vadd.f32 %v3535_v62, %v1547_v51  ;;  %v3548_v51 = vunpack.c.h.bf16 %v3575_v10 }
 0x388   : > { %v3765_v39 = vpop.f32.mrf.mxu1  ;;  %v3770_v48 = vpop.f32.mrf.mxu0 }
 0x389   : > { %v1929_v63 = vsel %vm1883_vm3, %v4877_v56, -inf  ;;  %v1932_v25 = vsel %vm1883_vm3, %v4889_v6, -inf  ;;  %v3577_v48 = vld [vmem:[%s5327_s8 + $0x68] sm:$0xff]  }
 0x38a   : > { %v1594_v2 = vpop.f32.mrf.mxu1  ;;  %1930 = vmax.xlane.f32.xlu1 %v1929_v63  ;;  %1921 = vmax.xlane.f32.xlu0 %v1920_v1  ;;  %v1550_v3 = vpop.f32.mrf.mxu0 }
 0x38b   : > { %v4887_v37 = vadd.f32 %v3539_v59, %v1594_v2  ;;  %v4907_v31 = vadd.f32 %v3536_v11, %v1550_v3  ;;  %v3544_v59 = vunpack.c.h.bf16 %v3574_v17  ;;  %v3576_v3 = vld [vmem:[%s5327_s8 + $0x60] sm:$0xff]  }
 0x38c   : > { %v3771_v46 = vpop.f32.mrf.mxu0  ;;  %v3776_v33 = vpop.f32.mrf.mxu1 }
 0x38d   : > { %v1938_v42 = vsel %vm1883_vm3, %v4887_v37, -inf  ;;  %v1886_v40 = vpop.xlane.xlu0 %1885  ;;  %v1935_v2 = vsel %vm1883_vm3, %v4907_v31, -inf }
 0x38e   : > { %1939 = vmax.xlane.f32.xlu0 %v1938_v42  ;;  %1924 = vmax.xlane.f32.xlu1 %v1923_v8  ;;  %v1641_v12 = vpop.f32.mrf.mxu0  ;;  %v1597_v16 = vpop.f32.mrf.mxu1  ;;  %v1980_v62 = vsub.f32 %v4792_v5, %v1886_v40  ;;  %v3555_v5 = vunpack.c.l.bf16 %v3577_v48  ;;  %v3551_v8 = vunpack.c.l.bf16 %v3576_v3 }
 0x38f   : > { %v4903_v18 = vadd.f32 %v3540_v47, %v1597_v16  ;;  %v4917_v63 = vadd.f32 %v3543_v34, %v1641_v12  ;;  %v3556_v34 = vunpack.c.h.bf16 %v3577_v48  ;;  %v3578_v48 = vld [vmem:[%s5327_s8 + $0x70] sm:$0xff]  }
 0x390   : > { %v3782_v22 = vpop.f32.mrf.mxu0  ;;  %v3777_v24 = vpop.f32.mrf.mxu1  ;;  %v2012_v11 = vmul.f32 1.442695, %v1980_v62 }
 0x391   : > { %v1941_v35 = vsel %vm1883_vm3, %v4903_v18, -inf  ;;  %v1944_v17 = vsel %vm1883_vm3, %v4917_v63, -inf }
 0x392   : > { %1933 = vmax.xlane.f32.xlu0 %v1932_v25  ;;  %v1644_v36 = vpop.f32.mrf.mxu0  ;;  %v1688_v41 = vpop.f32.mrf.mxu1  ;;  %1942 = vmax.xlane.f32.xlu1 %v1941_v35  ;;  %v3552_v35 = vunpack.c.h.bf16 %v3576_v3  ;;  %4192 = vpow2.f32 %v2012_v11 }
 0x393   : > { %v4911_v28 = vadd.f32 %v3547_v23, %v1688_v41  ;;  %v4928_v12 = vadd.f32 %v3544_v59, %v1644_v36  ;;  %v3579_v36 = vld [vmem:[%s5327_s8 + $0x78] sm:$0xff]  }
 0x394   : > { %v3783_v21 = vpop.f32.mrf.mxu0  ;;  %v3788_v39 = vpop.f32.mrf.mxu1 }
 0x395   : > { %v1950_v1 = vsel %vm1883_vm3, %v4911_v28, -inf }
 0x396   : > { %v1735_v46 = vpop.f32.mrf.mxu0  ;;  %v1691_v47 = vpop.f32.mrf.mxu1  ;;  %1951 = vmax.xlane.f32.xlu0 %v1950_v1  ;;  %1936 = vmax.xlane.f32.xlu1 %v1935_v2  ;;  %v3563_v1 = vunpack.c.l.bf16 %v3579_v36 }
 0x397   : > { %v4926_v33 = vadd.f32 %v3548_v51, %v1691_v47  ;;  %v4939_v41 = vadd.f32 %v3551_v8, %v1735_v46  ;;  %v1947_v51 = vsel %vm1883_vm3, %v4928_v12, -inf  ;;  %v3559_v47 = vunpack.c.l.bf16 %v3578_v48 }
 0x398   : > { %v3794_v42 = vpop.f32.mrf.mxu0  ;;  %v3789_v10 = vpop.f32.mrf.mxu1 }
 0x399   : > { %v1953_v16 = vsel %vm1883_vm3, %v4926_v33, -inf }
 0x39a   : > { %v1738_v22 = vpop.f32.mrf.mxu0  ;;  %v1782_v23 = vpop.f32.mrf.mxu1  ;;  %1954 = vmax.xlane.f32.xlu1 %v1953_v16  ;;  %1945 = vmax.xlane.f32.xlu0 %v1944_v17  ;;  %v3564_v16 = vunpack.c.h.bf16 %v3579_v36 }
 0x39b   : > { %v4934_v24 = vadd.f32 %v3555_v5, %v1782_v23  ;;  %v4950_v46 = vadd.f32 %v3552_v35, %v1738_v22  ;;  %v1956_v5 = vsel %vm1883_vm3, %v4939_v41, -inf  ;;  %v3560_v22 = vunpack.c.h.bf16 %v3578_v48 }
 0x39c   : > { %v3795_v25 = vpop.f32.mrf.mxu0  ;;  %v3800_v40 = vpop.f32.mrf.mxu1 }
 0x39d   : > { %v1962_v21 = vsel %vm1883_vm3, %v4934_v24, -inf  ;;  %v1959_v35 = vsel %vm1883_vm3, %v4950_v46, -inf }
 0x39e   : > { %v1829_v59 = vpop.f32.mrf.mxu0  ;;  %v1785_v39 = vpop.f32.mrf.mxu1  ;;  %1963 = vmax.xlane.f32.xlu0 %v1962_v21  ;;  %1948 = vmax.xlane.f32.xlu1 %v1947_v51 }
 0x39f   : > { %v4948_v62 = vadd.f32 %v3556_v34, %v1785_v39  ;;  %v4958_v25 = vadd.f32 %v3559_v47, %v1829_v59  ;;  %v4972_v48 = vpop.eup %4192  ;;  %v1892_v47 = vpop.xlane.xlu0 %1891 }
 0x3a0   : > { %v3801_v2 = vpop.f32.mrf.mxu1  ;;  %v3806_v3 = vpop.f32.mrf.mxu0 }
 0x3a1   : > { %v1965_v42 = vsel %vm1883_vm3, %v4948_v62, -inf  ;;  %v1968_v59 = vsel %vm1883_vm3, %v4958_v25, -inf  ;;  %v4978_v3 = vpop.permute.xlu1 %4111 }
 0x3a2   : > { %v1876_v8 = vpop.f32.mrf.mxu1  ;;  %1966 = vmax.xlane.f32.xlu1 %v1965_v42  ;;  %1957 = vmax.xlane.f32.xlu0 %v1956_v5  ;;  %v1832_v10 = vpop.f32.mrf.mxu0 }
 0x3a3   : > { %v4956_v11 = vadd.f32 %v3563_v1, %v1876_v8  ;;  %v4966_v39 = vadd.f32 %v3560_v22, %v1832_v10  ;;  %v2076_v1 = vsel %vm1883_vm3, %v4972_v48, 0.0  ;;  %v1898_v5 = vpop.xlane.xlu0 %1897 }
 0x3a4   : > { %v3807_v17 = vpop.f32.mrf.mxu0  ;;  %v3812_v23 = vpop.f32.mrf.mxu1 }
 0x3a5   : > { %v1974_v34 = vsel %vm1883_vm3, %v4956_v11, -inf  ;;  %v1971_v2 = vsel %vm1883_vm3, %v4966_v39, -inf  ;;  %v4982_v42 = vpop.permute.xlu1 %4131  ;;  %v1982_v17 = vsub.f32 %v4806_v15, %v1892_v47 }
 0x3a6   : > { %v1879_v40 = vpop.f32.mrf.mxu1  ;;  %1975 = vmax.xlane.f32.xlu0 %v1974_v34  ;;  %1960 = vmax.xlane.f32.xlu1 %v1959_v35 }
 0x3a7   : > { %v4964_v21 = vadd.f32 %v3564_v16, %v1879_v40  ;;  %v1895_v16 = vpop.xlane.xlu0 %1894  ;;  %v2016_v35 = vmul.f32 1.442695, %v1982_v17  ;;  %v1984_v40 = vsub.f32 %v4808_v19, %v1898_v5 }
 0x3a8   : > { %v3813_v51 = vpop.f32.mrf.mxu1  ;;  %v1983_v34 = vsub.f32 %v4817_v32, %v1895_v16 }
 0x3a9   : > { %v1977_v36 = vsel %vm1883_vm3, %v4964_v21, -inf  ;;  %v1889_v8 = vpop.xlane.xlu1 %1888 }
 0x3aa   : > { %1978 = vmax.xlane.f32.xlu1 %v1977_v36  ;;  %1969 = vmax.xlane.f32.xlu0 %v1968_v59  ;;  %v1981_v10 = vsub.f32 %v4802_v9, %v1889_v8  ;;  %v2018_v36 = vmul.f32 1.442695, %v1983_v34 }
 0x3ac   : > { %v2014_v23 = vmul.f32 1.442695, %v1981_v10 }
 0x3ad   : > { %v1901_v22 = vpop.xlane.xlu1 %1900 }
 0x3ae   : > { %2077 = vadd.xlane.f32.xlu0 %v2076_v1  ;;  %1972 = vmax.xlane.f32.xlu1 %v1971_v2  ;;  %4194 = vpow2.f32 %v2014_v23  ;;  %v1985_v51 = vsub.f32 %v4815_v30, %v1901_v22  ;;  %v1904_v1 = vpop.xlane.xlu0 %1903 }
 0x3af   : > { %4196 = vpow2.f32 %v2016_v35  ;;  %v1986_v15 = vsub.f32 %v4823_v45, %v1904_v1 }
 0x3b0   : > { %v2022_v2 = vmul.f32 1.442695, %v1985_v51  ;;  %4198 = vpow2.f32 %v2018_v36 }
 0x3b1   : > { %v1907_v59 = vpop.xlane.xlu1 %1906  ;;  %v2024_v32 = vmul.f32 1.442695, %v1986_v15 }
 0x3b2   : > { %v1987_v9 = vsub.f32 %v4827_v29, %v1907_v59 }
 0x3b4   : > { %v2026_v47 = vmul.f32 1.442695, %v1987_v9 }
 0x3bb   : > { %v4995_v19 = vpop.eup %4194 }
 0x3bc   : > { %v4997_v30 = vpop.eup %4196  ;;  %v2079_v5 = vsel %vm1883_vm3, %v4995_v19, 0.0 }
 0x3bd   : > { %v5001_v8 = vpop.eup %4198  ;;  %v2082_v45 = vsel %vm1883_vm3, %v4997_v30, 0.0 }
 0x3be   : > { %v2085_v10 = vsel %vm1883_vm3, %v5001_v8, 0.0 }
 0x3bf   : > { %4141 = vrot.lane.b32.xlu1 %v4717_v58, %s4395_s24 }
 0x3c4   : > { %4146 = vrot.lane.b32.xlu0 %v4676_v38, %s4395_s24 }
 0x3c8   : > { %4151 = vrot.lane.b32.xlu0 %v4654_v50, %s4396_s25  ;;  %v2020_v50 = vmul.f32 1.442695, %v1984_v40 }
 0x3ca   : > { %4200 = vpow2.f32 %v2020_v50 }
 0x3cb   : > { %4202 = vpow2.f32 %v2022_v2 }
 0x3cc   : > { %4204 = vpow2.f32 %v2026_v47 }
 0x3cd   : > { %4206 = vpow2.f32 %v2024_v32 }
 0x3d7   : > { %v5003_v29 = vpop.eup %4200 }
 0x3d8   : > { %v5009_v16 = vpop.eup %4202  ;;  %v2088_v23 = vsel %vm1883_vm3, %v5003_v29, 0.0 }
 0x3d9   : > { %v5011_v17 = vpop.eup %4204  ;;  %v2091_v22 = vsel %vm1883_vm3, %v5009_v16, 0.0 }
 0x3da   : > { %v5017_v34 = vpop.eup %4206  ;;  %v2097_v40 = vsel %vm1883_vm3, %v5011_v17, 0.0 }
 0x3db   : > { %v2094_v35 = vsel %vm1883_vm3, %v5017_v34, 0.0 }
 0x3e3   : > { %2080 = vadd.xlane.f32.xlu1 %v2079_v5 }
 0x3e7   : > { %2083 = vadd.xlane.f32.xlu0 %v2082_v45  ;;  %2086 = vadd.xlane.f32.xlu1 %v2085_v10 }
 0x3eb   : > { %2089 = vadd.xlane.f32.xlu0 %v2088_v23  ;;  %2092 = vadd.xlane.f32.xlu1 %v2091_v22 }
 0x3ef   : > { %2095 = vadd.xlane.f32.xlu0 %v2094_v35  ;;  %2098 = vadd.xlane.f32.xlu1 %v2097_v40 }
 0x401   : > { %v1916_v51 = vpop.xlane.xlu0 %1915 }
 0x402   : > { %v1990_v36 = vsub.f32 %v4839_v0, %v1916_v51 }
 0x404   : > { %v2032_v59 = vmul.f32 1.442695, %v1990_v36 }
 0x405   : > { %v1919_v1 = vpop.xlane.xlu1 %1918  ;;  %v1910_v50 = vpop.xlane.xlu0 %1909 }
 0x406   : > { %4208 = vpow2.f32 %v2032_v59  ;;  %v1991_v9 = vsub.f32 %v4845_v7, %v1919_v1  ;;  %v1988_v2 = vsub.f32 %v4841_v4, %v1910_v50 }
 0x408   : > { %v2034_v15 = vmul.f32 1.442695, %v1991_v9  ;;  %v2028_v47 = vmul.f32 1.442695, %v1988_v2 }
 0x409   : > { %v1913_v32 = vpop.xlane.xlu1 %1912 }
 0x40a   : > { %4210 = vpow2.f32 %v2034_v15  ;;  %v1989_v5 = vsub.f32 %v4847_v44, %v1913_v32 }
 0x40b   : > { %4212 = vpow2.f32 %v2028_v47 }
 0x40c   : > { %v2030_v45 = vmul.f32 1.442695, %v1989_v5 }
 0x40e   : > { %4214 = vpow2.f32 %v2030_v45 }
 0x40f   : > { %v1928_v10 = vpop.xlane.xlu0 %1927 }
 0x410   : > { %v1994_v0 = vsub.f32 %v4865_v27, %v1928_v10 }
 0x412   : > { %v2040_v23 = vmul.f32 1.442695, %v1994_v0 }
 0x413   : > { %v5028_v22 = vpop.eup %4208  ;;  %v1931_v35 = vpop.xlane.xlu1 %1930 }
 0x414   : > { %v1922_v40 = vpop.xlane.xlu0 %1921  ;;  %4216 = vpow2.f32 %v2040_v23  ;;  %v1995_v4 = vsub.f32 %v4877_v56, %v1931_v35  ;;  %v2106_v51 = vsel %vm1883_vm3, %v5028_v22, 0.0 }
 0x415   : > { %v1992_v7 = vsub.f32 %v4870_v20, %v1922_v40  ;;  %2107 = vadd.xlane.f32.xlu0 %v2106_v51 }
 0x416   : > { %v2042_v44 = vmul.f32 1.442695, %v1995_v4 }
 0x417   : > { %v2036_v36 = vmul.f32 1.442695, %v1992_v7  ;;  %v5034_v59 = vpop.eup %4210  ;;  %v1925_v27 = vpop.xlane.xlu1 %1924 }
 0x418   : > { %v1940_v1 = vpop.xlane.xlu0 %1939  ;;  %v5036_v50 = vpop.eup %4212  ;;  %4218 = vpow2.f32 %v2042_v44  ;;  %v1993_v2 = vsub.f32 %v4881_v60, %v1925_v27  ;;  %v2109_v20 = vsel %vm1883_vm3, %v5034_v59, 0.0 }
 0x419   : > { %v1998_v9 = vsub.f32 %v4887_v37, %v1940_v1  ;;  %4220 = vpow2.f32 %v2036_v36  ;;  %v2100_v56 = vsel %vm1883_vm3, %v5036_v50, 0.0  ;;  %2110 = vadd.xlane.f32.xlu1 %v2109_v20 }
 0x41a   : > { %v2038_v47 = vmul.f32 1.442695, %v1993_v2  ;;  %2101 = vadd.xlane.f32.xlu0 %v2100_v56 }
 0x41b   : > { %v2048_v15 = vmul.f32 1.442695, %v1998_v9  ;;  %v5044_v32 = vpop.eup %4214  ;;  %v1943_v45 = vpop.xlane.xlu1 %1942 }
 0x41c   : > { %v1934_v5 = vpop.xlane.xlu0 %1933  ;;  %v2103_v60 = vsel %vm1883_vm3, %v5044_v32, 0.0  ;;  %v1999_v10 = vsub.f32 %v4903_v18, %v1943_v45 }
 0x41d   : > { %4222 = vpow2.f32 %v2048_v15  ;;  %v1996_v37 = vsub.f32 %v4889_v6, %v1934_v5  ;;  %2104 = vadd.xlane.f32.xlu1 %v2103_v60 }
 0x41e   : > { %4224 = vpow2.f32 %v2038_v47  ;;  %v2050_v23 = vmul.f32 1.442695, %v1999_v10 }
 0x41f   : > { %v2044_v0 = vmul.f32 1.442695, %v1996_v37  ;;  %v1937_v40 = vpop.xlane.xlu1 %1936 }
 0x420   : > { %v1952_v35 = vpop.xlane.xlu0 %1951  ;;  %v1997_v51 = vsub.f32 %v4907_v31, %v1937_v40 }
 0x421   : > { %4226 = vpow2.f32 %v2044_v0  ;;  %v5050_v4 = vpop.eup %4216  ;;  %v2002_v7 = vsub.f32 %v4911_v28, %v1952_v35 }
 0x422   : > { %4228 = vpow2.f32 %v2050_v23  ;;  %v2118_v6 = vsel %vm1883_vm3, %v5050_v4, 0.0  ;;  %v2046_v44 = vmul.f32 1.442695, %v1997_v51 }
 0x423   : > { %2119 = vadd.xlane.f32.xlu0 %v2118_v6  ;;  %v2056_v36 = vmul.f32 1.442695, %v2002_v7  ;;  %v1955_v18 = vpop.xlane.xlu1 %1954 }
 0x424   : > { %v1946_v1 = vpop.xlane.xlu0 %1945  ;;  %v2003_v9 = vsub.f32 %v4926_v33, %v1955_v18  ;;  %4230 = vpow2.f32 %v2046_v44 }
 0x425   : > { %v5056_v27 = vpop.eup %4218  ;;  %v2000_v2 = vsub.f32 %v4917_v63, %v1946_v1  ;;  %4232 = vpow2.f32 %v2056_v36 }
 0x426   : > { %v5060_v20 = vpop.eup %4220  ;;  %v2121_v31 = vsel %vm1883_vm3, %v5056_v27, 0.0  ;;  %v2058_v15 = vmul.f32 1.442695, %v2003_v9 }
 0x427   : > { %v2052_v28 = vmul.f32 1.442695, %v2000_v2  ;;  %v2112_v56 = vsel %vm1883_vm3, %v5060_v20, 0.0  ;;  %2122 = vadd.xlane.f32.xlu1 %v2121_v31  ;;  %v1949_v47 = vpop.xlane.xlu1 %1948 }
 0x428   : > { %2113 = vadd.xlane.f32.xlu0 %v2112_v56  ;;  %v1964_v33 = vpop.xlane.xlu0 %1963  ;;  %v2001_v63 = vsub.f32 %v4928_v12, %v1949_v47 }
 0x429   : > { %4234 = vpow2.f32 %v2052_v28  ;;  %v2006_v10 = vsub.f32 %v4934_v24, %v1964_v33 }
 0x42a   : > { %v5066_v5 = vpop.eup %4222  ;;  %4236 = vpow2.f32 %v2058_v15  ;;  %v2054_v0 = vmul.f32 1.442695, %v2001_v63 }
 0x42b   : > { %v5069_v45 = vpop.eup %4224  ;;  %v2130_v37 = vsel %vm1883_vm3, %v5066_v5, 0.0  ;;  %v1967_v23 = vpop.xlane.xlu1 %1966  ;;  %v2064_v44 = vmul.f32 1.442695, %v2006_v10 }
 0x42c   : > { %v2115_v60 = vsel %vm1883_vm3, %v5069_v45, 0.0  ;;  %2131 = vadd.xlane.f32.xlu0 %v2130_v37  ;;  %v2007_v7 = vsub.f32 %v4948_v62, %v1967_v23  ;;  %v1958_v51 = vpop.xlane.xlu0 %1957  ;;  %4238 = vpow2.f32 %v2054_v0 }
 0x42d   : > { %2116 = vadd.xlane.f32.xlu1 %v2115_v60  ;;  %4240 = vpow2.f32 %v2064_v44 }
 0x42e   : > { %v5076_v35 = vpop.eup %4226  ;;  %v2066_v18 = vmul.f32 1.442695, %v2007_v7 }
 0x42f   : > { %v5078_v40 = vpop.eup %4228  ;;  %v2124_v12 = vsel %vm1883_vm3, %v5076_v35, 0.0  ;;  %v1961_v24 = vpop.xlane.xlu1 %1960 }
 0x430   : > { %v2133_v6 = vsel %vm1883_vm3, %v5078_v40, 0.0  ;;  %2125 = vadd.xlane.f32.xlu0 %v2124_v12  ;;  %v2005_v1 = vsub.f32 %v4950_v46, %v1961_v24  ;;  %v1976_v62 = vpop.xlane.xlu0 %1975  ;;  %4242 = vpow2.f32 %v2066_v18 }
 0x431   : > { %2134 = vadd.xlane.f32.xlu1 %v2133_v6  ;;  %v5085_v36 = vpop.eup %4230  ;;  %v2010_v56 = vsub.f32 %v4956_v11, %v1976_v62 }
 0x432   : > { %v2127_v9 = vsel %vm1883_vm3, %v5085_v36, 0.0  ;;  %v5090_v2 = vpop.eup %4232  ;;  %v2062_v15 = vmul.f32 1.442695, %v2005_v1 }
 0x433   : > { %v1979_v28 = vpop.xlane.xlu1 %1978  ;;  %v2142_v46 = vsel %vm1883_vm3, %v5090_v2, 0.0  ;;  %v2072_v63 = vmul.f32 1.442695, %v2010_v56 }
 0x434   : > { %4244 = vpow2.f32 %v2062_v15  ;;  %v2011_v37 = vsub.f32 %v4964_v21, %v1979_v28  ;;  %v2004_v15 = vsub.f32 %v4939_v41, %v1958_v51 }
 0x435   : > { %2128 = vadd.xlane.f32.xlu1 %v2127_v9  ;;  %4246 = vpow2.f32 %v2072_v63 }
 0x436   : > { %v5092_v31 = vpop.eup %4234  ;;  %v2074_v0 = vmul.f32 1.442695, %v2011_v37  ;;  %v2060_v63 = vmul.f32 1.442695, %v2004_v15 }
 0x437   : > { %v2136_v47 = vsel %vm1883_vm3, %v5092_v31, 0.0  ;;  %v5099_v33 = vpop.eup %4236  ;;  %v1973_v11 = vpop.xlane.xlu1 %1972 }
 0x438   : > { %2137 = vadd.xlane.f32.xlu0 %v2136_v47  ;;  %v2145_v60 = vsel %vm1883_vm3, %v5099_v33, 0.0  ;;  %v2009_v23 = vsub.f32 %v4966_v39, %v1973_v11  ;;  %4248 = vpow2.f32 %v2074_v0  ;;  %v1970_v47 = vpop.xlane.xlu0 %1969 }
 0x439   : > { %2143 = vadd.xlane.f32.xlu1 %v2142_v46  ;;  %v5104_v10 = vpop.eup %4238 }
 0x43a   : > { %v2139_v12 = vsel %vm1883_vm3, %v5104_v10, 0.0  ;;  %v5109_v7 = vpop.eup %4240  ;;  %v2070_v21 = vmul.f32 1.442695, %v2009_v23 }
 0x43b   : > { %v2154_v44 = vsel %vm1883_vm3, %v5109_v7, 0.0  ;;  %v5139_v0 = vpop.permute.xlu1 %4141 }
 0x43c   : > { %4250 = vpow2.f32 %v2070_v21 }
 0x43d   : > { %2146 = vadd.xlane.f32.xlu1 %v2145_v60  ;;  %v5111_v6 = vpop.eup %4242  ;;  %4252 = vpow2.f32 %v2060_v63  ;;  %v2078_v60 = vpop.xlane.xlu0 %2077 }
 0x43e   : > { %v2157_v24 = vsel %vm1883_vm3, %v5111_v6, 0.0 }
 0x441   : > { %2140 = vadd.xlane.f32.xlu1 %v2139_v12  ;;  %v5117_v18 = vpop.eup %4244  ;;  %v5137_v11 = vpop.permute.xlu0 %4146 }
 0x442   : > { %v2151_v39 = vsel %vm1883_vm3, %v5117_v18, 0.0  ;;  %v5121_v1 = vpop.eup %4246 }
 0x443   : > { %v2166_v9 = vsel %vm1883_vm3, %v5121_v1, 0.0 }
 0x445   : > { %2155 = vadd.xlane.f32.xlu1 %v2154_v44  ;;  %v5127_v62 = vpop.eup %4248  ;;  %v5145_v41 = vpop.permute.xlu0 %4151 }
 0x446   : > { %v2169_v28 = vsel %vm1883_vm3, %v5127_v62, 0.0 }
 0x449   : > { %2158 = vadd.xlane.f32.xlu1 %v2157_v24  ;;  %v5131_v56 = vpop.eup %4250 }
 0x44a   : > { %v2163_v46 = vsel %vm1883_vm3, %v5131_v56, 0.0  ;;  %v5141_v23 = vpop.eup %4252 }
 0x44d   : > { %2152 = vadd.xlane.f32.xlu1 %v2151_v39 }
 0x44e   : > { %4156 = vrot.lane.b32.xlu0 %v4642_v43, %s4396_s25  ;;  %v2008_v43 = vsub.f32 %v4958_v25, %v1970_v47  ;;  %v2148_v25 = vsel %vm1883_vm3, %v5141_v23, 0.0 }
 0x450   : > { %v2068_v37 = vmul.f32 1.442695, %v2008_v43 }
 0x451   : > { %2167 = vadd.xlane.f32.xlu1 %v2166_v9 }
 0x452   : > { %4254 = vpow2.f32 %v2068_v37 }
 0x453   : > { %4256 = vrcp.f32 %v2078_v60  ;;  %v1052_v60 = vpack.c.bf16 %v4709_v57, %v4663_v53  ;;  %v4123_v53 = vunpack.i.l.bf16 %v4863_v26 }
 0x455   : > { %2170 = vadd.xlane.f32.xlu1 %v2169_v28 }
 0x459   : > { %2164 = vadd.xlane.f32.xlu1 %v2163_v46 }
 0x45f   : > { %v5149_v12 = vpop.eup %4254 }
 0x460   : > { %v2160_v21 = vsel %vm1883_vm3, %v5149_v12, 0.0  ;;  %v4257_v9 = vpop.eup %4256 }
 0x461   : > { %v2204_v46 = vmul.f32 %v4257_v9, %v4972_v48 }
 0x46a   : > { %4166 = vrot.lane.b32.xlu1 %v4676_v38, %s4396_s25 }
 0x46c   : > { %v2081_v51 = vpop.xlane.xlu1 %2080 }
 0x46d   : > { %2149 = vadd.xlane.f32.xlu0 %v2148_v25  ;;  %4258 = vrcp.f32 %v2081_v51 }
 0x470   : > { %v2084_v44 = vpop.xlane.xlu0 %2083  ;;  %v2087_v24 = vpop.xlane.xlu1 %2086 }
 0x471   : > { %2161 = vadd.xlane.f32.xlu0 %v2160_v21  ;;  %4260 = vrcp.f32 %v2084_v44 }
 0x472   : > { %4262 = vrcp.f32 %v2087_v24  ;;  %v4124_v24 = vunpack.i.h.bf16 %v4863_v26  ;;  %v4114_v26 = vunpack.i.h.bf16 %v4978_v3 }
 0x474   : > { %v2090_v38 = vpop.xlane.xlu0 %2089  ;;  %v2093_v39 = vpop.xlane.xlu1 %2092  ;;  %v1054_v9 = vpack.c.bf16 %v4124_v24, %v4123_v53  ;;  %v4138_v24 = vunpack.i.l.bf16 %v4898_v14 }
 0x475   : > { %4264 = vrcp.f32 %v2090_v38 }
 0x476   : > { %4266 = vrcp.f32 %v2093_v39 }
 0x478   : > { %v2096_v28 = vpop.xlane.xlu0 %2095  ;;  %v2099_v15 = vpop.xlane.xlu1 %2098 }
 0x479   : > { %4268 = vrcp.f32 %v2096_v28 }
 0x47a   : > { %v4259_v47 = vpop.eup %4258  ;;  %4270 = vrcp.f32 %v2099_v15 }
 0x47b   : > { %v2205_v63 = vmul.f32 %v4259_v47, %v4995_v19 }
 0x47d   : > { %v2236_v43 = vpack.c.bf16 %v2205_v63, %v2204_v46  ;;  %v4134_v46 = vunpack.i.h.bf16 %v4982_v42  ;;  %v4133_v63 = vunpack.i.l.bf16 %v4982_v42 }
 0x47e   : > { %v4261_v37 = vpop.eup %4260 }
 0x47f   : > { %v4263_v25 = vpop.eup %4262  ;;  %3817 = vmatmul.mubr.msk.bf16.vlgmr.msra.gmra.mxu0 %vm1883_vm3, %v2236_v43  ;;  %v2206_v51 = vmul.f32 %v4261_v37, %v4997_v30 }
 0x480   : > { %3827 = vmatpush3.bf16.msra.mxu0 %v1052_v60  ;;  %v2207_v21 = vmul.f32 %v4263_v25, %v5001_v8  ;;  %3828 = vmatprep.mubr.msk.bf16.mxu0 %vm4393_vm1, %v4392_v49 }
 0x481   : > { %3838 = vmatprep.subr.bf16.mxu0 %v4392_v49 }
 0x482   : > { %v4265_v48 = vpop.eup %4264  ;;  %v2237_v19 = vpack.c.bf16 %v2207_v21, %v2206_v51 }
 0x483   : > { %v4267_v44 = vpop.eup %4266  ;;  %v2208_v57 = vmul.f32 %v4265_v48, %v5003_v29  ;;  %v4113_v29 = vunpack.i.l.bf16 %v4978_v3 }
 0x484   : > { %3823 = vmatmul.mubr.msk.bf16.vlgmr.msra.gmra.mxu1 %vm1883_vm3, %v2237_v19  ;;  %v2209_v30 = vmul.f32 %v4267_v44, %v5009_v16  ;;  %v1057_v19 = vpack.c.bf16 %v4134_v46, %v4133_v63  ;;  %v4139_v44 = vunpack.i.h.bf16 %v4898_v14  ;;  %v4148_v63 = vunpack.i.l.bf16 %v5137_v11 }
 0x485   : > { %3833 = vmatpush3.bf16.msra.mxu1 %v1053_v55  ;;  %3834 = vmatprep.mubr.msk.bf16.mxu1 %vm4393_vm1, %v4392_v49  ;;  %v1055_v55 = vpack.c.bf16 %v4114_v26, %v4113_v29 }
 0x486   : > { %v4269_v8 = vpop.eup %4268  ;;  %v2238_v38 = vpack.c.bf16 %v2209_v30, %v2208_v57  ;;  %3844 = vmatprep.subr.bf16.mxu1 %v4392_v49 }
 0x487   : > { %v4271_v39 = vpop.eup %4270  ;;  %4161 = vrot.lane.b32.xlu0 %v4717_v58, %s4396_s25  ;;  %v2210_v16 = vmul.f32 %v4269_v8, %v5017_v34 }
 0x488   : > { %3829 = vmatmul.mubr.msk.bf16.vlgmr.msra.gmra.mxu0 %vm1883_vm3, %v2238_v38  ;;  %v2211_v52 = vmul.f32 %v4271_v39, %v5011_v17  ;;  %v4119_v38 = vunpack.i.h.bf16 %v4856_v13  ;;  %v4118_v39 = vunpack.i.l.bf16 %v4856_v13 }
 0x489   : > { %3839 = vmatpush3.bf16.msra.mxu0 %v1054_v9  ;;  %3840 = vmatprep.mubr.msk.bf16.mxu0 %vm4393_vm1, %v4392_v49 }
 0x48a   : > { %v2239_v54 = vpack.c.bf16 %v2211_v52, %v2210_v16  ;;  %3850 = vmatprep.subr.bf16.mxu0 %v4392_v49 }
 0x48c   : > { %3835 = vmatmul.mubr.msk.bf16.vlgmr.msra.gmra.mxu1 %vm1883_vm3, %v2239_v54  ;;  %v1059_v54 = vpack.c.bf16 %v4119_v38, %v4118_v39 }
 0x48d   : > { %3845 = vmatpush3.bf16.msra.mxu1 %v1055_v55  ;;  %3846 = vmatprep.mubr.msk.bf16.mxu1 %vm4393_vm1, %v4392_v49 }
 0x48e   : > { %3856 = vmatprep.subr.bf16.mxu1 %v4392_v49 }
 0x49e   : > { %v2108_v58 = vpop.xlane.xlu0 %2107 }
 0x49f   : > { %4272 = vrcp.f32 %v2108_v58 }
 0x4a2   : > { %v2111_v3 = vpop.xlane.xlu1 %2110 }
 0x4a3   : > { %v2102_v17 = vpop.xlane.xlu0 %2101  ;;  %4274 = vrcp.f32 %v2111_v3  ;;  %v4129_v3 = vunpack.i.h.bf16 %v4879_v61 }
 0x4a4   : > { %4276 = vrcp.f32 %v2102_v17  ;;  %v4128_v17 = vunpack.i.l.bf16 %v4879_v61  ;;  %v4149_v61 = vunpack.i.h.bf16 %v5137_v11  ;;  %v4144_v11 = vunpack.i.h.bf16 %v5139_v0 }
 0x4a6   : > { %v2105_v34 = vpop.xlane.xlu1 %2104  ;;  %v1058_v46 = vpack.c.bf16 %v4129_v3, %v4128_v17 }
 0x4a7   : > { %4278 = vrcp.f32 %v2105_v34 }
 0x4ac   : > { %v2120_v28 = vpop.xlane.xlu0 %2119  ;;  %v4273_v15 = vpop.eup %4272 }
 0x4ad   : > { %4280 = vrcp.f32 %v2120_v28  ;;  %v2214_v60 = vmul.f32 %v4273_v15, %v5028_v22 }
 0x4b0   : > { %v4275_v47 = vpop.eup %4274  ;;  %v2123_v43 = vpop.xlane.xlu1 %2122 }
 0x4b1   : > { %v2114_v37 = vpop.xlane.xlu0 %2113  ;;  %4282 = vrcp.f32 %v2123_v43  ;;  %v2215_v25 = vmul.f32 %v4275_v47, %v5034_v59  ;;  %v4277_v51 = vpop.eup %4276  ;;  %v1056_v59 = vpack.c.bf16 %v4139_v44, %v4138_v24 }
 0x4b2   : > { %4284 = vrcp.f32 %v2114_v37  ;;  %v2212_v42 = vmul.f32 %v4277_v51, %v5036_v50  ;;  %v1061_v51 = vpack.c.bf16 %v4149_v61, %v4148_v63 }
 0x4b3   : > { %v2241_v21 = vpack.c.bf16 %v2215_v25, %v2214_v60 }
 0x4b4   : > { %v4279_v48 = vpop.eup %4278 }
 0x4b5   : > { %v2132_v53 = vpop.xlane.xlu0 %2131  ;;  %3847 = vmatmul.mubr.msk.bf16.vlgmr.msra.gmra.mxu1 %vm1883_vm3, %v2241_v21  ;;  %v2213_v30 = vmul.f32 %v4279_v48, %v5044_v32  ;;  %v4143_v21 = vunpack.i.l.bf16 %v5139_v0 }
 0x4b6   : > { %v2117_v57 = vpop.xlane.xlu1 %2116  ;;  %3857 = vmatpush3.bf16.msra.mxu1 %v1057_v19  ;;  %3858 = vmatprep.mubr.msk.bf16.mxu1 %vm4393_vm1, %v4392_v49 }
 0x4b7   : > { %4286 = vrcp.f32 %v2117_v57  ;;  %v2240_v22 = vpack.c.bf16 %v2213_v30, %v2212_v42  ;;  %3868 = vmatprep.subr.bf16.mxu1 %v4392_v49  ;;  %v1060_v44 = vpack.c.bf16 %v4144_v11, %v4143_v21 }
 0x4b8   : > { %4288 = vrcp.f32 %v2132_v53 }
 0x4b9   : > { %3841 = vmatmul.mubr.msk.bf16.vlgmr.msra.gmra.mxu0 %vm1883_vm3, %v2240_v22  ;;  %v2126_v8 = vpop.xlane.xlu0 %2125 }
 0x4ba   : > { %v2135_v14 = vpop.xlane.xlu1 %2134  ;;  %3851 = vmatpush3.bf16.msra.mxu0 %v1056_v59  ;;  %3852 = vmatprep.mubr.msk.bf16.mxu0 %vm4393_vm1, %v4392_v49  ;;  %v4281_v50 = vpop.eup %4280 }
 0x4bb   : > { %4290 = vrcp.f32 %v2135_v14  ;;  %3862 = vmatprep.subr.bf16.mxu0 %v4392_v49  ;;  %v2218_v26 = vmul.f32 %v4281_v50, %v5050_v4  ;;  %v4154_v50 = vunpack.i.h.bf16 %v5145_v41 }
 0x4bc   : > { %4292 = vrcp.f32 %v2126_v8 }
 0x4be   : > { %v4283_v32 = vpop.eup %4282  ;;  %v2129_v9 = vpop.xlane.xlu1 %2128 }
 0x4bf   : > { %4294 = vrcp.f32 %v2129_v9  ;;  %v2219_v29 = vmul.f32 %v4283_v32, %v5056_v27  ;;  %v4285_v52 = vpop.eup %4284  ;;  %v4153_v32 = vunpack.i.l.bf16 %v5145_v41 }
 0x4c0   : > { %v2216_v13 = vmul.f32 %v4285_v52, %v5060_v20 }
 0x4c1   : > { %v2243_v16 = vpack.c.bf16 %v2219_v29, %v2218_v26  ;;  %v2138_v34 = vpop.xlane.xlu0 %2137 }
 0x4c2   : > { %v2144_v55 = vpop.xlane.xlu1 %2143 }
 0x4c3   : > { %3859 = vmatmul.mubr.msk.bf16.vlgmr.msra.gmra.mxu1 %vm1883_vm3, %v2243_v16  ;;  %4296 = vrcp.f32 %v2144_v55 }
 0x4c4   : > { %v4287_v58 = vpop.eup %4286  ;;  %3869 = vmatpush3.bf16.msra.mxu1 %v1059_v54  ;;  %3870 = vmatprep.mubr.msk.bf16.mxu1 %vm4393_vm1, %v4392_v49 }
 0x4c5   : > { %v2217_v4 = vmul.f32 %v4287_v58, %v5069_v45  ;;  %3880 = vmatprep.subr.bf16.mxu1 %v4392_v49  ;;  %v4289_v27 = vpop.eup %4288  ;;  %v4157_v24 = vpop.permute.xlu0 %4156 }
 0x4c6   : > { %v2147_v28 = vpop.xlane.xlu1 %2146  ;;  %v2222_v20 = vmul.f32 %v4289_v27, %v5066_v5  ;;  %v4158_v57 = vunpack.i.l.bf16 %v4157_v24 }
 0x4c7   : > { %4298 = vrcp.f32 %v2147_v28  ;;  %v2242_v15 = vpack.c.bf16 %v2217_v4, %v2216_v13  ;;  %v2972_v13 = vld [vmem:[#allocation4] sm:$0xf] }
 0x4c8   : > { %v4291_v47 = vpop.eup %4290  ;;  %4300 = vrcp.f32 %v2138_v34  ;;  %v3069_v28 = vsel %vm2987_vm4, %v2972_v13, 0 }
 0x4c9   : > { %3853 = vmatmul.mubr.msk.bf16.vlgmr.msra.gmra.mxu0 %vm1883_vm3, %v2242_v15  ;;  %v2223_v45 = vmul.f32 %v4291_v47, %v5078_v40  ;;  %v4293_v43 = vpop.eup %4292 }
 0x4ca   : > { %3863 = vmatpush3.bf16.msra.mxu0 %v1058_v46  ;;  %v2141_v37 = vpop.xlane.xlu1 %2140  ;;  %3864 = vmatprep.mubr.msk.bf16.mxu0 %vm4393_vm1, %v4392_v49  ;;  %v2220_v5 = vmul.f32 %v4293_v43, %v5076_v35 }
 0x4cb   : > { %4302 = vrcp.f32 %v2141_v37  ;;  %v2245_v60 = vpack.c.bf16 %v2223_v45, %v2222_v20  ;;  %3874 = vmatprep.subr.bf16.mxu0 %v4392_v49 }
 0x4cc   : > { %v4295_v25 = vpop.eup %4294 }
 0x4cd   : > { %3871 = vmatmul.mubr.msk.bf16.vlgmr.msra.gmra.mxu1 %vm1883_vm3, %v2245_v60  ;;  %v2221_v40 = vmul.f32 %v4295_v25, %v5085_v36  ;;  %v4159_v36 = vunpack.i.h.bf16 %v4157_v24  ;;  %v2974_v25 = vld [vmem:[#allocation4 + $0x4] sm:$0xf] }
 0x4ce   : > { %3881 = vmatpush3.bf16.msra.mxu1 %v1061_v51  ;;  %v2156_v48 = vpop.xlane.xlu1 %2155  ;;  %3882 = vmatprep.mubr.msk.bf16.mxu1 %vm4393_vm1, %v4392_v49 }
 0x4cf   : > { %v2244_v19 = vpack.c.bf16 %v2221_v40, %v2220_v5  ;;  %3892 = vmatprep.subr.bf16.mxu1 %v4392_v49  ;;  %4304 = vrcp.f32 %v2156_v48  ;;  %v1063_v38 = vpack.c.bf16 %v4159_v36, %v4158_v57  ;;  %v3137_v5 = vld [vmem:[#allocation4 + $0x8] sm:$0xf]  ;;  %v3227_v40 = vld [vmem:[#allocation4 + $0xc] sm:$0xf] }
 0x4d0   : > { %v4297_v0 = vpop.eup %4296  ;;  %v3241_v36 = vsel %vm2987_vm4, %v3227_v40, 0 }
 0x4d1   : > { %3865 = vmatmul.mubr.msk.bf16.vlgmr.msra.gmra.mxu0 %vm1883_vm3, %v2244_v19  ;;  %v2226_v42 = vmul.f32 %v4297_v0, %v5090_v2 }
 0x4d2   : > { %3875 = vmatpush3.bf16.msra.mxu0 %v1060_v44  ;;  %v2159_v53 = vpop.xlane.xlu1 %2158  ;;  %3876 = vmatprep.mubr.msk.bf16.mxu0 %vm4393_vm1, %v4392_v49 }
 0x4d3   : > { %4306 = vrcp.f32 %v2159_v53  ;;  %3886 = vmatprep.subr.bf16.mxu0 %v4392_v49 }
 0x4d4   : > { %v4299_v35 = vpop.eup %4298 }
 0x4d5   : > { %v2227_v30 = vmul.f32 %v4299_v35, %v5099_v33  ;;  %v4301_v22 = vpop.eup %4300  ;;  %v1062_v33 = vpack.c.bf16 %v4154_v50, %v4153_v32 }
 0x4d6   : > { %v2153_v59 = vpop.xlane.xlu1 %2152  ;;  %v2224_v39 = vmul.f32 %v4301_v22, %v5092_v31 }
 0x4d7   : > { %v2247_v14 = vpack.c.bf16 %v2227_v30, %v2226_v42 }
 0x4d8   : > { %v4303_v8 = vpop.eup %4302 }
 0x4d9   : > { %3883 = vmatmul.mubr.msk.bf16.vlgmr.msra.gmra.mxu1 %vm1883_vm3, %v2247_v14  ;;  %v2225_v9 = vmul.f32 %v4303_v8, %v5104_v10 }
 0x4da   : > { %3893 = vmatpush3.bf16.msra.mxu1 %v1063_v38  ;;  %v2168_v26 = vpop.xlane.xlu1 %2167  ;;  %3894 = vmatprep.mubr.msk.bf16.mxu1 %vm4393_vm1, %v4392_v49 }
 0x4db   : > { %v2246_v2 = vpack.c.bf16 %v2225_v9, %v2224_v39  ;;  %3904 = vmatprep.subr.bf16.mxu1 %v4392_v49  ;;  %4308 = vrcp.f32 %v2168_v26 }
 0x4dc   : > { %v4305_v41 = vpop.eup %4304 }
 0x4dd   : > { %3877 = vmatmul.mubr.msk.bf16.vlgmr.msra.gmra.mxu0 %vm1883_vm3, %v2246_v2  ;;  %v2230_v10 = vmul.f32 %v4305_v41, %v5109_v7 }
 0x4de   : > { %3887 = vmatpush3.bf16.msra.mxu0 %v1062_v33  ;;  %v2171_v29 = vpop.xlane.xlu1 %2170  ;;  %3888 = vmatprep.mubr.msk.bf16.mxu0 %vm4393_vm1, %v4392_v49 }
 0x4df   : > { %4310 = vrcp.f32 %v2171_v29  ;;  %3898 = vmatprep.subr.bf16.mxu0 %v4392_v49 }
 0x4e0   : > { %v4307_v31 = vpop.eup %4306  ;;  %4312 = vrcp.f32 %v2153_v59 }
 0x4e1   : > { %v2231_v16 = vmul.f32 %v4307_v31, %v5111_v6 }
 0x4e2   : > { %v2165_v52 = vpop.xlane.xlu1 %2164 }
 0x4e3   : > { %v2249_v54 = vpack.c.bf16 %v2231_v16, %v2230_v10 }
 0x4e5   : > { %3895 = vmatmul.mubr.msk.bf16.vlgmr.msra.gmra.mxu1 %vm1883_vm3, %v2249_v54 }
 0x4e6   : > { %v4167_v55 = vpop.permute.xlu1 %4166  ;;  %3906 = vmatprep.mubr.msk.bf16.mxu1 %vm4393_vm1, %v4392_v49 }
 0x4e7   : > { %v4169_v58 = vunpack.i.h.bf16 %v4167_v55  ;;  %v4168_v3 = vunpack.i.l.bf16 %v4167_v55 }
 0x4e8   : > { %v4309_v4 = vpop.eup %4308 }
 0x4e9   : > { %v1065_v17 = vpack.c.bf16 %v4169_v58, %v4168_v3  ;;  %v2234_v7 = vmul.f32 %v4309_v4, %v5121_v1 }
 0x4eb   : > { %3905 = vmatpush3.bf16.msra.mxu1 %v1065_v17 }
 0x4ec   : > { %v4311_v27 = vpop.eup %4310  ;;  %3951 = vmatprep.subr.msk.bf16.mxu1 %vm2987_vm4, %v2972_v13 }
 0x4ed   : > { %v2235_v6 = vmul.f32 %v4311_v27, %v5127_v62  ;;  %v4313_v61 = vpop.eup %4312 }
 0x4ee   : > { %v2229_v62 = vmul.f32 %v4313_v61, %v5117_v18  ;;  %v2989_v18 = vsel %vm2987_vm4, %v2974_v25, 0 }
 0x4ef   : > { %v2251_v34 = vpack.c.bf16 %v2235_v6, %v2234_v7 }
 0x4f1   : > { %3907 = vmatmul.mubr.msk.bf16.vlgmr.msra.gmra.mxu1 %vm1883_vm3, %v2251_v34 }
 0x4f2   : > { %3921 = vmatpush3.bf16.msra.mxu1 %v3069_v28 }
 0x4f3   : > { %3953 = vmatprep.subr.msk.bf16.mxu1 %vm2987_vm4, %v3227_v40 }
 0x4f6   : > { %v2150_v15 = vpop.xlane.xlu0 %2149 }
 0x4f7   : > { %4314 = vrcp.f32 %v2150_v15 }
 0x4fa   : > { %v2162_v47 = vpop.xlane.xlu0 %2161 }
 0x4fb   : > { %4316 = vrcp.f32 %v2162_v47 }
 0x4fc   : > { %4318 = vrcp.f32 %v2165_v52  ;;  %v3151_v52 = vsel %vm2987_vm4, %v3137_v5, 0 }
 0x4fe   : > { %v4162_v46 = vpop.permute.xlu0 %4161 }
 0x4ff   : > { %v4164_v20 = vunpack.i.h.bf16 %v4162_v46  ;;  %v4163_v45 = vunpack.i.l.bf16 %v4162_v46 }
 0x501   : > { %v1064_v60 = vpack.c.bf16 %v4164_v20, %v4163_v45 }
 0x504   : > { %v4315_v63 = vpop.eup %4314 }
 0x505   : > { %v2228_v1 = vmul.f32 %v4315_v63, %v5141_v23 }
 0x507   : > { %v2248_v43 = vpack.c.bf16 %v2229_v62, %v2228_v1 }
 0x508   : > { %v4317_v37 = vpop.eup %4316 }
 0x509   : > { %3889 = vmatmul.mubr.msk.bf16.vlgmr.msra.gmra.mxu0 %vm1883_vm3, %v2248_v43  ;;  %v4319_v51 = vpop.eup %4318  ;;  %v2232_v11 = vmul.f32 %v4317_v37, %v5149_v12 }
 0x50a   : > { %3899 = vmatpush3.bf16.msra.mxu0 %v1064_v60  ;;  %3900 = vmatprep.mubr.msk.bf16.mxu0 %vm4393_vm1, %v4392_v49  ;;  %v2233_v21 = vmul.f32 %v4319_v51, %v5131_v56 }
 0x50b   : > { %3950 = vmatprep.subr.msk.bf16.mxu0 %vm2987_vm4, %v2974_v25 }
 0x50c   : > { %v2250_v23 = vpack.c.bf16 %v2233_v21, %v2232_v11 }
 0x511   : > { %3901 = vmatmul.mubr.msk.bf16.vlgmr.msra.gmra.mxu0 %vm1883_vm3, %v2250_v23 }
 0x512   : > { %3911 = vmatpush3.bf16.msra.mxu0 %v2989_v18 }
 0x513   : > { %3952 = vmatprep.subr.msk.bf16.mxu0 %vm2987_vm4, %v3137_v5 }
 0x53f   : > { %v2289_v48 = vpop.f32.mrf.mxu0 }
 0x541   : > { %v3818_v49 = vpop.f32.mrf.mxu0 }
 0x543   : > { %v2292_v19 = vpop.f32.mrf.mxu0 }
 0x544   : > { %v2956_v12 = vpack.c.bf16 %v2292_v19, %v2289_v48  ;;  %v2333_v44 = vpop.f32.mrf.mxu1 }
 0x545   : > { %v3819_v24 = vpop.f32.mrf.mxu0 }
 0x546   : > { %v3824_v0 = vpop.f32.mrf.mxu1  ;;  %3922 = vmatprep.mubr.msk.bf16.mxu1 %vm1130_vm2, %v2956_v12 }
 0x548   : > { %v2336_v56 = vpop.f32.mrf.mxu1  ;;  %v2377_v53 = vpop.f32.mrf.mxu0 }
 0x549   : > { %v2957_v35 = vpack.c.bf16 %v2336_v56, %v2333_v44 }
 0x54a   : > { %v3825_v57 = vpop.f32.mrf.mxu1  ;;  %v3830_v42 = vpop.f32.mrf.mxu0 }
 0x54b   : > { %3923 = vmatmul.mubr.msk.bf16.vlgmr.msra.gmra.mxu1 %vm1130_vm2, %v2957_v35 }
 0x54c   : > { %v2380_v30 = vpop.f32.mrf.mxu0  ;;  %v2421_v22 = vpop.f32.mrf.mxu1  ;;  %3941 = vmatpush3.bf16.msra.mxu1 %v3241_v36 }
 0x54d   : > { %v2958_v59 = vpack.c.bf16 %v2380_v30, %v2377_v53 }
 0x54e   : > { %v3831_v14 = vpop.f32.mrf.mxu0  ;;  %v3836_v8 = vpop.f32.mrf.mxu1 }
 0x54f   : > { %3926 = vmatprep.mubr.msk.bf16.mxu1 %vm1130_vm2, %v2958_v59 }
 0x550   : > { %v2424_v50 = vpop.f32.mrf.mxu1 }
 0x551   : > { %v2959_v32 = vpack.c.bf16 %v2424_v50, %v2421_v22 }
 0x552   : > { %v3837_v38 = vpop.f32.mrf.mxu1 }
 0x553   : > { %3927 = vmatmul.mubr.msk.bf16.gmra.mxu1 %vm1130_vm2, %v2959_v32 }
 0x575   : > { %v2509_v39 = vpop.f32.mrf.mxu1 }
 0x577   : > { %v3848_v9 = vpop.f32.mrf.mxu1 }
 0x579   : > { %v2465_v26 = vpop.f32.mrf.mxu0  ;;  %v2512_v2 = vpop.f32.mrf.mxu1 }
 0x57a   : > { %v2961_v10 = vpack.c.bf16 %v2512_v2, %v2509_v39 }
 0x57b   : > { %v3842_v33 = vpop.f32.mrf.mxu0  ;;  %v3849_v41 = vpop.f32.mrf.mxu1 }
 0x57d   : > { %v2468_v29 = vpop.f32.mrf.mxu0 }
 0x57e   : > { %v2960_v31 = vpack.c.bf16 %v2468_v29, %v2465_v26 }
 0x57f   : > { %v3843_v16 = vpop.f32.mrf.mxu0 }
 0x580   : > { %3912 = vmatprep.mubr.msk.bf16.mxu0 %vm1130_vm2, %v2960_v31 }
 0x581   : > { %3913 = vmatmul.mubr.msk.bf16.vlgmr.msra.gmra.mxu0 %vm1130_vm2, %v2961_v10 }
 0x582   : > { %3931 = vmatpush3.bf16.msra.mxu0 %v3151_v52 }
 0x583   : > { %v2597_v54 = vpop.f32.mrf.mxu1 }
 0x585   : > { %v3860_v55 = vpop.f32.mrf.mxu1 }
 0x587   : > { %v2600_v58 = vpop.f32.mrf.mxu1 }
 0x588   : > { %v2963_v6 = vpack.c.bf16 %v2600_v58, %v2597_v54 }
 0x589   : > { %v2553_v3 = vpop.f32.mrf.mxu0  ;;  %v3861_v17 = vpop.f32.mrf.mxu1 }
 0x58b   : > { %v3854_v13 = vpop.f32.mrf.mxu0 }
 0x58d   : > { %v2556_v4 = vpop.f32.mrf.mxu0  ;;  %v2685_v27 = vpop.f32.mrf.mxu1 }
 0x58e   : > { %v2962_v7 = vpack.c.bf16 %v2556_v4, %v2553_v3 }
 0x58f   : > { %v3855_v34 = vpop.f32.mrf.mxu0  ;;  %v3872_v28 = vpop.f32.mrf.mxu1 }
 0x590   : > { %3916 = vmatprep.mubr.msk.bf16.mxu0 %vm1130_vm2, %v2962_v7  ;;  %v3498_v28 = vld [vmem:[%s5326_s7] ss:$0 sm:$0xff] }
 0x591   : > { %v2641_v15 = vpop.f32.mrf.mxu0  ;;  %v2688_v47 = vpop.f32.mrf.mxu1  ;;  %3917 = vmatmul.mubr.msk.bf16.gmra.mxu0 %vm1130_vm2, %v2963_v6 }
 0x592   : > { %v2965_v45 = vpack.c.bf16 %v2688_v47, %v2685_v27 }
 0x593   : > { %v3866_v46 = vpop.f32.mrf.mxu0  ;;  %v3873_v61 = vpop.f32.mrf.mxu1 }
 0x595   : > { %v2644_v63 = vpop.f32.mrf.mxu0 }
 0x596   : > { %v2964_v20 = vpack.c.bf16 %v2644_v63, %v2641_v15 }
 0x597   : > { %v3867_v1 = vpop.f32.mrf.mxu0 }
 0x598   : > { %3932 = vmatprep.mubr.msk.bf16.mxu0 %vm1130_vm2, %v2964_v20 }
 0x599   : > { %v2773_v62 = vpop.f32.mrf.mxu1  ;;  %3933 = vmatmul.mubr.msk.bf16.vlgmr.msra.gmra.mxu0 %vm1130_vm2, %v2965_v45 }
 0x59b   : > { %v3884_v43 = vpop.f32.mrf.mxu1 }
 0x59d   : > { %v2729_v37 = vpop.f32.mrf.mxu0  ;;  %v2776_v60 = vpop.f32.mrf.mxu1 }
 0x59e   : > { %v2967_v23 = vpack.c.bf16 %v2776_v60, %v2773_v62 }
 0x59f   : > { %v3878_v25 = vpop.f32.mrf.mxu0  ;;  %v3885_v51 = vpop.f32.mrf.mxu1 }
 0x5a1   : > { %v2732_v11 = vpop.f32.mrf.mxu0 }
 0x5a2   : > { %v2966_v21 = vpack.c.bf16 %v2732_v11, %v2729_v37 }
 0x5a3   : > { %v3879_v18 = vpop.f32.mrf.mxu0 }
 0x5a4   : > { %3936 = vmatprep.mubr.msk.bf16.mxu0 %vm1130_vm2, %v2966_v21 }
 0x5a5   : > { %v2861_v5 = vpop.f32.mrf.mxu1  ;;  %3937 = vmatmul.mubr.msk.bf16.gmra.mxu0 %vm1130_vm2, %v2967_v23 }
 0x5a7   : > { %v3896_v40 = vpop.f32.mrf.mxu1 }
 0x5a9   : > { %v2864_v48 = vpop.f32.mrf.mxu1 }
 0x5aa   : > { %v2969_v36 = vpack.c.bf16 %v2864_v48, %v2861_v5 }
 0x5ab   : > { %v3897_v49 = vpop.f32.mrf.mxu1 }
 0x5b1   : > { %v2949_v19 = vpop.f32.mrf.mxu1 }
 0x5b3   : > { %v3908_v12 = vpop.f32.mrf.mxu1 }
 0x5b5   : > { %v2952_v44 = vpop.f32.mrf.mxu1 }
 0x5b6   : > { %v2971_v14 = vpack.c.bf16 %v2952_v44, %v2949_v19 }
 0x5b7   : > { %v3909_v24 = vpop.f32.mrf.mxu1 }
 0x5c9   : > { %v2817_v0 = vpop.f32.mrf.mxu0 }
 0x5cb   : > { %v3890_v56 = vpop.f32.mrf.mxu0 }
 0x5cd   : > { %v2820_v53 = vpop.f32.mrf.mxu0 }
 0x5ce   : > { %v2968_v35 = vpack.c.bf16 %v2820_v53, %v2817_v0 }
 0x5cf   : > { %v3891_v57 = vpop.f32.mrf.mxu0 }
 0x5d0   : > { %3942 = vmatprep.mubr.msk.bf16.mxu1 %vm1130_vm2, %v2968_v35 }
 0x5d1   : > { %v2905_v42 = vpop.f32.mrf.mxu0  ;;  %3943 = vmatmul.mubr.msk.bf16.vlgmr.msra.gmra.mxu1 %vm1130_vm2, %v2969_v36 }
 0x5d3   : > { %v3902_v30 = vpop.f32.mrf.mxu0 }
 0x5d5   : > { %v2908_v22 = vpop.f32.mrf.mxu0 }
 0x5d6   : > { %v2970_v59 = vpack.c.bf16 %v2908_v22, %v2905_v42 }
 0x5d7   : > { %v3903_v8 = vpop.f32.mrf.mxu0 }
 0x5d8   : > { %3946 = vmatprep.mubr.msk.bf16.mxu1 %vm1130_vm2, %v2970_v59 }
 0x5d9   : > { %3947 = vmatmul.mubr.msk.bf16.gmra.mxu1 %vm1130_vm2, %v2971_v14 }
 0x60b   : > { %v3924_v26 = vpop.f32.mrf.mxu1 }
 0x60d   : > { %v3105_v33 = vpop.f32.mrf.mxu1 }
 0x60f   : > { %v3925_v29 = vpop.f32.mrf.mxu1 }
 0x611   : > { %v3108_v10 = vpop.f32.mrf.mxu1 }
 0x613   : > { %v3928_v52 = vpop.f32.mrf.mxu1 }
 0x615   : > { %v3121_v55 = vpop.f32.mrf.mxu1 }
 0x617   : > { %v3929_v3 = vpop.f32.mrf.mxu1 }
 0x619   : > { %v3124_v4 = vpop.f32.mrf.mxu1 }
 0x641   : > { %v3914_v50 = vpop.f32.mrf.mxu0 }
 0x642   : > { %v3114_v13 = vadd.f32 %v3924_v26, %v3914_v50 }
 0x643   : > { %v3025_v32 = vpop.f32.mrf.mxu0 }
 0x644   : > { %v3106_v7 = vadd.f32 %v3105_v33, %v3025_v32 }
 0x645   : > { %v3915_v38 = vpop.f32.mrf.mxu0 }
 0x646   : > { %v3117_v15 = vadd.f32 %v3925_v29, %v3915_v38 }
 0x647   : > { %v3028_v39 = vpop.f32.mrf.mxu0 }
 0x648   : > { %v3109_v20 = vadd.f32 %v3108_v10, %v3028_v39 }
 0x651   : > { %v3918_v9 = vpop.f32.mrf.mxu0 }
 0x652   : > { %v3130_v37 = vadd.f32 %v3928_v52, %v3918_v9 }
 0x653   : > { %v3041_v2 = vpop.f32.mrf.mxu0 }
 0x654   : > { %v3122_v23 = vadd.f32 %v3121_v55, %v3041_v2 }
 0x655   : > { %v3919_v41 = vpop.f32.mrf.mxu0 }
 0x656   : > { %v3133_v49 = vadd.f32 %v3929_v3, %v3919_v41 }
 0x657   : > { %v3044_v31 = vpop.f32.mrf.mxu0 }
 0x658   : > { %v3125_v56 = vadd.f32 %v3124_v4, %v3044_v31 }
 0x659   : > { %v3934_v16 = vpop.f32.mrf.mxu0 }
 0x65a   : > { %v3220_v6 = vadd.f32 %v3934_v16, %v3114_v13 }
 0x65b   : > { %v3187_v54 = vpop.f32.mrf.mxu0 }
 0x65c   : > { %v3218_v47 = vadd.f32 %v3187_v54, %v3106_v7 }
 0x65d   : > { %v3935_v58 = vpop.f32.mrf.mxu0 }
 0x65e   : > { %v3221_v45 = vadd.f32 %v3935_v58, %v3117_v15 }
 0x65f   : > { %v3190_v17 = vpop.f32.mrf.mxu0 }
 0x660   : > { %v3219_v60 = vadd.f32 %v3190_v17, %v3109_v20 }
 0x665   : > { %v3938_v27 = vpop.f32.mrf.mxu0 }
 0x666   : > { %v3224_v18 = vadd.f32 %v3938_v27, %v3130_v37 }
 0x667   : > { %v3203_v61 = vpop.f32.mrf.mxu0 }
 0x668   : > { %v3222_v19 = vadd.f32 %v3203_v61, %v3122_v23 }
 0x669   : > { %v3939_v11 = vpop.f32.mrf.mxu0 }
 0x66a   : > { %v3225_v53 = vadd.f32 %v3939_v11, %v3133_v49 }
 0x66b   : > { %v3206_v24 = vpop.f32.mrf.mxu0 }
 0x66c   : > { %v3223_v42 = vadd.f32 %v3206_v24, %v3125_v56 }
 0x691   : > { %v3944_v34 = vpop.f32.mrf.mxu1 }
 0x692   : > { %v3310_v46 = vadd.f32 %v3944_v34, %v3220_v6 }
 0x693   : > { %v3277_v63 = vpop.f32.mrf.mxu1 }
 0x694   : > { %v3325_v1 = vadd.f32 %v3498_v28, %v3310_v46  ;;  %v3308_v62 = vadd.f32 %v3277_v63, %v3218_v47 }
 0x695   : > { %v3945_v43 = vpop.f32.mrf.mxu1 }
 0x696   : > { %3333 = vst.msk [vmem:[%s5298_s11 + $0x10] sm:$0xff] %vm375_vm0, %v3325_v1  ;;  %v3323_v25 = vadd.f32 %v3498_v28, %v3308_v62  ;;  %v3311_v51 = vadd.f32 %v3945_v43, %v3221_v45 }
 0x697   : > { %v3280_v21 = vpop.f32.mrf.mxu1 }
 0x698   : > { %3331 = vst.msk [vmem:[%s5298_s11] sm:$0xff] %vm375_vm0, %v3323_v25  ;;  %v3326_v5 = vadd.f32 %v3498_v28, %v3311_v51  ;;  %v3309_v40 = vadd.f32 %v3280_v21, %v3219_v60 }
 0x699   : > { %v3948_v48 = vpop.f32.mrf.mxu1 }
 0x69a   : > { %3334 = vst.msk [vmem:[%s5298_s11 + $0x18] sm:$0xff] %vm375_vm0, %v3326_v5  ;;  %v3324_v12 = vadd.f32 %v3498_v28, %v3309_v40  ;;  %v3314_v44 = vadd.f32 %v3948_v48, %v3224_v18 }
 0x69b   : > { %v3293_v0 = vpop.f32.mrf.mxu1 }
 0x69c   : > { %3332 = vst.msk [vmem:[%s5298_s11 + $0x8] sm:$0xff] %vm375_vm0, %v3324_v12  ;;  %v3329_v35 = vadd.f32 %v3498_v28, %v3314_v44  ;;  %v3312_v36 = vadd.f32 %v3293_v0, %v3222_v19 }
 0x69d   : > { %v3949_v57 = vpop.f32.mrf.mxu1 }
 0x69e   : > { %3337 = vst.msk [vmem:[%s5298_s11 + $0x30] sm:$0xff] %vm375_vm0, %v3329_v35  ;;  %v3327_v30 = vadd.f32 %v3498_v28, %v3312_v36  ;;  %v3315_v22 = vadd.f32 %v3949_v57, %v3225_v53 }
 0x69f   : > { %v3296_v59 = vpop.f32.mrf.mxu1 }
 0x6a0   : > { %3335 = vst.msk [vmem:[%s5298_s11 + $0x20] sm:$0xff] %vm375_vm0, %v3327_v30  ;;  %v3330_v14 = vadd.f32 %v3498_v28, %v3315_v22  ;;  %v3313_v8 = vadd.f32 %v3296_v59, %v3223_v42 }
 0x6a2   : > { %3338 = vst.msk [vmem:[%s5298_s11 + $0x38] sm:$0xff] %vm375_vm0, %v3330_v14  ;;  %v3328_v50 = vadd.f32 %v3498_v28, %v3313_v8 }
 0x6a4   : > { %3336 = vst.msk [vmem:[%s5298_s11 + $0x28] sm:$0xff] %vm375_vm0, %v3328_v50 }
 0x6a5 PF: > { %s21_s30 = sadd.s32 1, %s4386_s30  }
 0x6a6   : > { %p18_p2 = scmp.ge.s32.totalorder %s21_s30, 4  }
 0x6a8   :  { %20 = sbr.rel (!%p18_p2) target bundleno = 2 (0x2), region = 98 }
 0x6ad   :  { %3361 = vsyncpa [#allocation3], 1 }
 0x6ae   :  { %3363 = vsyncpa [#allocation3 + $0x1], 1 }
 0x6af   :  { %3364 = vsyncpa [#allocation5], 1 }

</bundles_post_ra>
